<compile_context>
chip_gen: v7x
topology: tpu7x:2x2x1
jax: 0.10.0
libtpu: 0.0.40
codegen_flags: <defaults>
</compile_context>

<pallas_src>
import math

import numpy as np

import jax
import jax.numpy as jnp
from jax.experimental import pallas as pl
from jax.experimental.pallas import tpu as pltpu

# ----------------------------- static config --------------------------------
DEPTH = 2
IN_CH = 1
MID_CH = 16
OUT_CH = 1
MAX_CH = 64
KSIZE = 8
STRIDE = 4
GROWTH = 2
RESAMPLE = 2        # forward supports 1/2/4; 2 exercises upsample2/downsample2
NORMALIZE = False   # normalize=True in the PyTorch code std()'s a size-1 dim (NaN)
FLOOR = 1e-3
ZEROS = 56          # sinc resampler half width -> 112 taps
GB = 128            # per-gate lane block inside the LSTM kernels (one vreg)
VMEM_LIMIT = 32 * 1024 * 1024


def _round_up(n, m):
    return ((n + m - 1) // m) * m


# ------------------------ sinc resampler (resample=2) ------------------------
def _sinc_taps(zeros=ZEROS):
    """kernel_upsample2 / kernel_downsample2 taps as Python float constants."""
    taps = []
    for i in range(2 * zeros):
        w = 0.5 * (1.0 - math.cos(2.0 * math.pi * (2 * i + 1) / (4.0 * zeros)))
        t = (-zeros + 0.5 + i) * math.pi
        taps.append(math.sin(t) / t * w)
    return taps


_TAPS = _sinc_taps()
_KFIR = len(_TAPS)   # 112


def _build_tap_mats():
    """Block-banded tap matrices: out_blk = A @ TA + B @ TB for consecutive
    128-wide input blocks A, B (valid because K=112 <= 129)."""
    ta = np.zeros((128, 128), np.float32)
    tb = np.zeros((128, 128), np.float32)
    for u in range(128):
        for k in range(_KFIR):
            c = u + k
            if c < 128:
                ta[c, u] = _TAPS[k]
            else:
                tb[c - 128, u] = _TAPS[k]
    return ta, tb


_TA_NP, _TB_NP = _build_tap_mats()


def _make_fir_kernel(fuse_even):
    def kernel(*refs):
        if fuse_even:
            a_ref, b_ref, ta_ref, tb_ref, xe_ref, o_ref = refs
        else:
            a_ref, b_ref, ta_ref, tb_ref, o_ref = refs
        a = a_ref[...].astype(jnp.bfloat16)
        b = b_ref[...].astype(jnp.bfloat16)
        acc = (jnp.dot(a, ta_ref[...], preferred_element_type=jnp.float32)
               + jnp.dot(b, tb_ref[...], preferred_element_type=jnp.float32))
        if fuse_even:
            acc = (acc + xe_ref[...]) * 0.5
        o_ref[...] = acc
    return kernel


def _fir_apply(x_rows, t_out, left_pad, xeven=None):
    """x_rows: [R, Tin] -> [R, t_out]; out[t] = sum_k taps[k] * xpad[t + k]."""
    R, Tin = x_rows.shape
    nb = pl.cdiv(t_out, 128)
    t_pad = nb * 128
    width = (nb + 1) * 128                       # blocks 0..nb inclusive exist
    xp = jnp.pad(x_rows, ((0, 0), (left_pad, width - left_pad - Tin)))
    ta = jnp.asarray(_TA_NP, dtype=jnp.bfloat16)
    tb = jnp.asarray(_TB_NP, dtype=jnp.bfloat16)

    in_specs = [pl.BlockSpec((R, 128), lambda j: (0, j)),
                pl.BlockSpec((R, 128), lambda j: (0, j + 1)),
                pl.BlockSpec((128, 128), lambda j: (0, 0)),
                pl.BlockSpec((128, 128), lambda j: (0, 0))]
    args = [xp, xp, ta, tb]
    if xeven is not None:
        xe = jnp.pad(xeven, ((0, 0), (0, t_pad - xeven.shape[1])))
        in_specs.append(pl.BlockSpec((R, 128), lambda j: (0, j)))
        args.append(xe)

    out = pl.pallas_call(
        _make_fir_kernel(xeven is not None),
        grid=(nb,),
        in_specs=in_specs,
        out_specs=pl.BlockSpec((R, 128), lambda j: (0, j)),
        out_shape=jax.ShapeDtypeStruct((R, t_pad), jnp.float32),
        compiler_params=pltpu.CompilerParams(
            dimension_semantics=("parallel",), vmem_limit_bytes=VMEM_LIMIT),
    )(*args)
    return out[:, :t_out]


def upsample2(x):
    """x: [B, C, T] -> [B, C, 2T] (sinc interpolation, matches torch upsample2)."""
    B, C, T = x.shape
    rows = x.reshape(B * C, T)
    up = _fir_apply(rows, T, ZEROS - 1).reshape(B, C, T)
    return jnp.stack([x, up], axis=-1).reshape(B, C, 2 * T)


def downsample2(x):
    """x: [B, C, T] -> [B, C, ceil(T/2)] (matches torch downsample2)."""
    B, C, T = x.shape
    if T % 2 != 0:
        x = jnp.pad(x, ((0, 0), (0, 0), (0, 1)))
        T += 1
    Th = T // 2
    xeven = x[..., 0::2].reshape(B * C, Th)
    xodd = x[..., 1::2].reshape(B * C, Th)
    out = _fir_apply(xodd, Th, ZEROS, xeven=xeven)
    return out.reshape(B, C, Th)


# --------------------------- fused encoder stage -----------------------------
def _make_enc_kernel(t_out):
    def kernel(xp_ref, wlo_ref, whi_ref, b1_ref, w2_ref, b2_ref, o_ref):
        xp = xp_ref[...]                              # [4*Cin, Tcol] f32
        width = xp.shape[1]
        x_hi = pltpu.roll(xp, shift=width - 1, axis=1)  # x_hi[:, t] = xp[:, t+1]
        xlo = xp[:, :t_out].astype(jnp.bfloat16)
        xhi = x_hi[:, :t_out].astype(jnp.bfloat16)
        h = (jnp.dot(wlo_ref[...], xlo, preferred_element_type=jnp.float32)
             + jnp.dot(whi_ref[...], xhi, preferred_element_type=jnp.float32)
             + b1_ref[...])
        h = jnp.maximum(h, 0.0)
        y = jnp.dot(w2_ref[...], h.astype(jnp.bfloat16),
                    preferred_element_type=jnp.float32) + b2_ref[...]
        o_ref[...] = jnp.maximum(y, 0.0)
    return kernel


def encoder_stage(x, e):
    """relu(Conv1d(k=8,s=4)) -> relu(Conv1d(1)). x: [B,Cin,T] -> [B,mid,Tout]."""
    B, Cin, T = x.shape
    mid = e['wlo'].shape[0]
    Tout = (T - KSIZE) // STRIDE + 1
    To = _round_up(max(Tout, 1), 128)
    Tcol = To + 128
    Tp = Tout + 1
    # Phase-major de-interleave (same total size as x; no im2col expansion).
    xph = jnp.stack([x[:, :, p:p + 4 * Tp:4] for p in range(4)], axis=2)
    xph = xph.reshape(B, Cin * 4, Tp)
    xph = jnp.pad(xph, ((0, 0), (0, 0), (0, Tcol - Tp)))

    out = pl.pallas_call(
        _make_enc_kernel(To),
        grid=(B,),
        in_specs=[pl.BlockSpec((None, Cin * 4, Tcol), lambda b: (b, 0, 0)),
                  pl.BlockSpec((mid, Cin * 4), lambda b: (0, 0)),
                  pl.BlockSpec((mid, Cin * 4), lambda b: (0, 0)),
                  pl.BlockSpec((mid, 1), lambda b: (0, 0)),
                  pl.BlockSpec((mid, mid), lambda b: (0, 0)),
                  pl.BlockSpec((mid, 1), lambda b: (0, 0))],
        out_specs=pl.BlockSpec((None, mid, To), lambda b: (b, 0, 0)),
        out_shape=jax.ShapeDtypeStruct((B, mid, To), jnp.float32),
        compiler_params=pltpu.CompilerParams(
            dimension_semantics=("parallel",), vmem_limit_bytes=VMEM_LIMIT),
    )(xph, e['wlo'], e['whi'], e['b1'], e['w2'], e['b2'])
    return out[:, :, :Tout]


# --------------------------- fused decoder stage -----------------------------
def _make_dec_kernel(tin, relu):
    def kernel(x_ref, skip_ref, w1_ref, b1_ref, wtl_ref, wth_ref, bt_ref, o_ref):
        xs = x_ref[...] + skip_ref[...]                 # skip-add fused
        h = jnp.dot(w1_ref[...], xs.astype(jnp.bfloat16),
                    preferred_element_type=jnp.float32) + b1_ref[...]
        h = jnp.maximum(h, 0.0)
        # zero the padded columns so the overlap-add roll wrap stays clean and
        # the last output step only receives the high-tap contribution
        lane = jax.lax.broadcasted_iota(jnp.int32, h.shape, 1)
        h = jnp.where(lane < tin, h, 0.0).astype(jnp.bfloat16)
        u_lo = jnp.dot(wtl_ref[...], h, preferred_element_type=jnp.float32)
        u_hi = jnp.dot(wth_ref[...], h, preferred_element_type=jnp.float32)
        out = u_lo + pltpu.roll(u_hi, shift=1, axis=1) + bt_ref[...]
        if relu:
            out = jnp.maximum(out, 0.0)
        o_ref[...] = out
    return kernel


def decoder_stage(x, skip, d, relu):
    """(x+skip) -> relu(Conv1d(1)) -> ConvTranspose1d(k=8, s=4) [+ReLU]."""
    B, C, Tin = x.shape
    Cout4 = d['wtl'].shape[0]
    Cout = Cout4 // STRIDE
    Tpad = _round_up(Tin + 1, 128)
    xp = jnp.pad(x, ((0, 0), (0, 0), (0, Tpad - Tin)))
    sp = jnp.pad(skip, ((0, 0), (0, 0), (0, Tpad - Tin)))

    o = pl.pallas_call(
        _make_dec_kernel(Tin, relu),
        grid=(B,),
        in_specs=[pl.BlockSpec((None, C, Tpad), lambda b: (b, 0, 0)),
                  pl.BlockSpec((None, C, Tpad), lambda b: (b, 0, 0)),
                  pl.BlockSpec((C, C), lambda b: (0, 0)),
                  pl.BlockSpec((C, 1), lambda b: (0, 0)),
                  pl.BlockSpec((Cout4, C), lambda b: (0, 0)),
                  pl.BlockSpec((Cout4, C), lambda b: (0, 0)),
                  pl.BlockSpec((Cout4, 1), lambda b: (0, 0))],
        out_specs=pl.BlockSpec((None, Cout4, Tpad), lambda b: (b, 0, 0)),
        out_shape=jax.ShapeDtypeStruct((B, Cout4, Tpad), jnp.float32),
        compiler_params=pltpu.CompilerParams(
            dimension_semantics=("parallel",), vmem_limit_bytes=VMEM_LIMIT),
    )(xp, sp, d['w1'], d['b1'], d['wtl'], d['wth'], d['bt4'])

    # interleave the 4 phases back to sample order: out[b,co,4t+p] = o[b,co*4+p,t]
    o = o[:, :, :Tin + 1].reshape(B, Cout, STRIDE, Tin + 1)
    return jnp.transpose(o, (0, 1, 3, 2)).reshape(B, Cout, STRIDE * (Tin + 1))


# ---------------------------- BLSTM bottleneck --------------------------------
# Gate layout: gates is [B, 4*GB]; gate g (i,f,g,o) owns lanes [g*GB,(g+1)*GB);
# within a block, cols [0:H) = forward dir, [H:2H) = backward dir, rest is
# structurally-zero padding (zero weights & bias).

def _pack_input_weight(w_block, dirn, row_off, rows_total, H):
    """w_block: [4H, Din] (PyTorch i,f,g,o rows) -> [rows_total, 4*GB]."""
    Din = w_block.shape[1]
    W = jnp.zeros((rows_total, 4 * GB), jnp.float32)
    for g in range(4):
        W = W.at[row_off:row_off + Din,
                 g * GB + dirn * H:g * GB + (dirn + 1) * H].set(
                     jnp.transpose(w_block[g * H:(g + 1) * H, :]))
    return W


def _pack_recurrent(whh_f, whh_b, H):
    W = jnp.zeros((2 * H, 4 * GB), jnp.float32)
    for g in range(4):
        W = W.at[0:H, g * GB:g * GB + H].set(
            jnp.transpose(whh_f[g * H:(g + 1) * H, :]))
        W = W.at[H:2 * H, g * GB + H:g * GB + 2 * H].set(
            jnp.transpose(whh_b[g * H:(g + 1) * H, :]))
    return W


def _pack_bias(b_ih_f, b_hh_f, b_ih_b, b_hh_b, H):
    b = jnp.zeros((1, 4 * GB), jnp.float32)
    for g in range(4):
        b = b.at[0, g * GB:g * GB + H].set(
            b_ih_f[g * H:(g + 1) * H] + b_hh_f[g * H:(g + 1) * H])
        b = b.at[0, g * GB + H:g * GB + 2 * H].set(
            b_ih_b[g * H:(g + 1) * H] + b_hh_b[g * H:(g + 1) * H])
    return b


def _sigmoid_eup(x):
    # reciprocal rides the EUP slot instead of a VALU divide
    return pl.reciprocal(1.0 + jnp.exp(-x), approx=True)


def _lstm_gate_math(gates, c):
    i = _sigmoid_eup(gates[:, 0 * GB:1 * GB])
    f = _sigmoid_eup(gates[:, 1 * GB:2 * GB])
    g = jnp.tanh(gates[:, 2 * GB:3 * GB])
    o = _sigmoid_eup(gates[:, 3 * GB:4 * GB])
    c = f * c + i * g
    h = o * jnp.tanh(c)
    return h, c


def _lstm_rec_kernel(pf_ref, pb_ref, whh_ref, b_ref, oa_ref, ob_ref):
    """BiLSTM recurrence only: one small recurrent matmul per step.
    pf/pb are the hoisted input projections (fwd / bwd gate columns)."""
    T, Bsz, _ = pf_ref.shape
    hidden2 = whh_ref.shape[0]                 # 2H

    def body(t, carry):
        h, c = carry
        rev = T - 1 - t
        gates = (pf_ref[t] + pb_ref[rev]
                 + jnp.dot(h[:, :hidden2], whh_ref[...],
                           preferred_element_type=jnp.float32)
                 + b_ref[...])
        h, c = _lstm_gate_math(gates, c)
        h2 = h[:, :hidden2]                    # [B, 2H]: [h_fwd(t) | h_bwd(rev)]
        oa_ref[t] = h2                         # fwd half valid at index t
        ob_ref[rev] = h2                       # bwd half valid at index rev
        return (h, c)

    init = (jnp.zeros((Bsz, GB), jnp.float32), jnp.zeros((Bsz, GB), jnp.float32))
    jax.lax.fori_loop(0, T, body, init)


def _lstm_rec(pf, pb, whh, b, H):
    T, B, _ = pf.shape
    return pl.pallas_call(
        _lstm_rec_kernel,
        out_shape=(jax.ShapeDtypeStruct((T, B, 2 * H), jnp.float32),
                   jax.ShapeDtypeStruct((T, B, 2 * H), jnp.float32)),
        compiler_params=pltpu.CompilerParams(vmem_limit_bytes=VMEM_LIMIT),
    )(pf, pb, whh, b)


def _proj(x_bf16, w_bf16):
    return jnp.einsum('tbh,hg->tbg', x_bf16, w_bf16,
                      preferred_element_type=jnp.float32)


def blstm_apply(p, x):
    """Bidirectional 2-layer LSTM + Linear(2H->H). x: [B, H, T] -> [B, H, T]."""
    B, H, T = x.shape
    x_tbh = jnp.transpose(x, (2, 0, 1)).astype(jnp.bfloat16)   # [T, B, H]

    # ---- layer 0: input projections hoisted out of the recurrence ----
    pf0 = _proj(x_tbh, p['wxf0'])
    pb0 = _proj(x_tbh, p['wxb0'])
    oa, ob = _lstm_rec(pf0, pb0, p['whh0'], p['b0'], H)

    # ---- layer 1: projections of the layer-0 outputs, hoisted ----
    oab, obb = oa.astype(jnp.bfloat16), ob.astype(jnp.bfloat16)
    p1f = _proj(oab, p['waf']) + _proj(obb, p['wbf'])
    p1b = _proj(oab, p['wab']) + _proj(obb, p['wbb'])
    oa1, ob1 = _lstm_rec(p1f, p1b, p['whh1'], p['b1'], H)

    # ---- final Linear(2H -> H): one batched matmul after the recurrence ----
    y = (jnp.einsum('tbh,oh->tbo', oa1[..., :H].astype(jnp.bfloat16),
                    p['lin_wf'], preferred_element_type=jnp.float32)
         + jnp.einsum('tbh,oh->tbo', ob1[..., H:].astype(jnp.bfloat16),
                      p['lin_wb'], preferred_element_type=jnp.float32)
         + p['lin_b'])
    return jnp.transpose(y, (1, 2, 0))                          # [B, H, T]


# ------------------------------ UNet2 forward ---------------------------------
def valid_length(length):
    length = math.ceil(length * RESAMPLE)
    for _ in range(DEPTH):
        length = math.ceil((length - KSIZE) / STRIDE) + 1
        length = max(length, 1)
    for _ in range(DEPTH):
        length = (length - 1) * STRIDE + KSIZE
    return int(math.ceil(length / RESAMPLE))


@jax.jit
def unet2_forward(packed, mix):
    """mix: [B, L] float32 -> (out [B, L], y=None).  enr is None path."""
    B, L = mix.shape
    std = 1.0                                   # normalize=False branch
    length = L
    x = mix[:, None, :]                         # [B, C=1, L]
    x = jnp.pad(x, ((0, 0), (0, 0), (0, valid_length(length) - length)))
    if RESAMPLE == 2:
        x = upsample2(x)
    elif RESAMPLE == 4:
        x = upsample2(upsample2(x))

    skips = []
    for e in packed['enc']:
        x = encoder_stage(x, e)
        skips.append(x)                         # enr is None -> no transform/adpt

    x = blstm_apply(packed['lstm'], x)

    n_dec = len(packed['dec'])
    for j, d in enumerate(packed['dec']):
        skip = skips.pop(-1)
        x = decoder_stage(x, skip[..., :x.shape[-1]], d, relu=(j < n_dec - 1))

    if RESAMPLE == 2:
        x = downsample2(x)
    elif RESAMPLE == 4:
        x = downsample2(downsample2(x))

    out = x.reshape(B, -1)[:, :length]          # 'b c t -> b (c t)'
    return std * out, None


# ------------------------------ parameter init --------------------------------
def init_params(key):
    keys = iter(jax.random.split(key, 128))

    def uinit(shape, fan):
        bound = 1.0 / math.sqrt(fan)
        return jax.random.uniform(next(keys), shape, jnp.float32, -bound, bound)

    enc, dec = [], []
    in_c, mid_c, out_c = IN_CH, MID_CH, OUT_CH
    for _ in range(DEPTH):
        enc.append({
            'w1': uinit((mid_c, in_c, KSIZE), in_c * KSIZE),
            'b1': uinit((mid_c,), in_c * KSIZE),
            'w2': uinit((mid_c, mid_c, 1), mid_c),
            'b2': uinit((mid_c,), mid_c),
        })
        dec.insert(0, {
            'w1': uinit((mid_c, mid_c, 1), mid_c),
            'b1': uinit((mid_c,), mid_c),
            'wt': uinit((mid_c, out_c, KSIZE), mid_c * KSIZE),  # ConvT: [Cin,Cout,K]
            'bt': uinit((out_c,), mid_c * KSIZE),
        })
        out_c = mid_c
        in_c = mid_c
        mid_c = min(int(GROWTH * mid_c), MAX_CH)

    H = in_c  # bottleneck dim (= last mid_channels)
    lstm = {}
    for l in range(2):
        isz = H if l == 0 else 2 * H
        for dr in range(2):
            lstm[f'w_ih_l{l}d{dr}'] = uinit((4 * H, isz), H)
            lstm[f'w_hh_l{l}d{dr}'] = uinit((4 * H, H), H)
            lstm[f'b_ih_l{l}d{dr}'] = uinit((4 * H,), H)
            lstm[f'b_hh_l{l}d{dr}'] = uinit((4 * H,), H)
    lstm['lin_w'] = uinit((H, 2 * H), 2 * H)
    lstm['lin_b'] = uinit((H,), 2 * H)

    return {'enc': enc, 'dec': dec, 'lstm': lstm}


def pack_params(params):
    """One-time weight packing (outside jit): kernel-ready layouts + bf16 casts."""
    packed = {'enc': [], 'dec': [], 'lstm': {}}
    for e in params['enc']:
        mid, cin, _ = e['w1'].shape
        packed['enc'].append({
            'wlo': e['w1'][:, :, :STRIDE].reshape(mid, cin * STRIDE).astype(jnp.bfloat16),
            'whi': e['w1'][:, :, STRIDE:].reshape(mid, cin * STRIDE).astype(jnp.bfloat16),
            'b1': e['b1'][:, None].astype(jnp.float32),
            'w2': e['w2'][:, :, 0].astype(jnp.bfloat16),
            'b2': e['b2'][:, None].astype(jnp.float32),
        })
    for d in params['dec']:
        c, cout, _ = d['wt'].shape
        packed['dec'].append({
            'w1': d['w1'][:, :, 0].astype(jnp.bfloat16),
            'b1': d['b1'][:, None].astype(jnp.float32),
            'wtl': jnp.transpose(d['wt'][:, :, :STRIDE], (1, 2, 0))
                   .reshape(cout * STRIDE, c).astype(jnp.bfloat16),
            'wth': jnp.transpose(d['wt'][:, :, STRIDE:], (1, 2, 0))
                   .reshape(cout * STRIDE, c).astype(jnp.bfloat16),
            'bt4': jnp.repeat(d['bt'], STRIDE)[:, None].astype(jnp.float32),
        })

    p = params['lstm']
    H = p['lin_w'].shape[0]
    assert 2 * H <= GB, "gate block must hold both directions"
    L = packed['lstm']
    L['wxf0'] = _pack_input_weight(p['w_ih_l0d0'], 0, 0, H, H).astype(jnp.bfloat16)
    L['wxb0'] = _pack_input_weight(p['w_ih_l0d1'], 1, 0, H, H).astype(jnp.bfloat16)
    L['whh0'] = _pack_recurrent(p['w_hh_l0d0'], p['w_hh_l0d1'], H)
    L['b0'] = _pack_bias(p['b_ih_l0d0'], p['b_hh_l0d0'],
                         p['b_ih_l0d1'], p['b_hh_l0d1'], H)
    L['waf'] = _pack_input_weight(p['w_ih_l1d0'][:, :H], 0, 0, 2 * H, H).astype(jnp.bfloat16)
    L['wbf'] = _pack_input_weight(p['w_ih_l1d0'][:, H:], 0, H, 2 * H, H).astype(jnp.bfloat16)
    L['wab'] = _pack_input_weight(p['w_ih_l1d1'][:, :H], 1, 0, 2 * H, H).astype(jnp.bfloat16)
    L['wbb'] = _pack_input_weight(p['w_ih_l1d1'][:, H:], 1, H, 2 * H, H).astype(jnp.bfloat16)
    L['whh1'] = _pack_recurrent(p['w_hh_l1d0'], p['w_hh_l1d1'], H)
    L['b1'] = _pack_bias(p['b_ih_l1d0'], p['b_hh_l1d0'],
                         p['b_ih_l1d1'], p['b_hh_l1d1'], H)
    L['lin_wf'] = p['lin_w'][:, :H].astype(jnp.bfloat16)
    L['lin_wb'] = p['lin_w'][:, H:].astype(jnp.bfloat16)
    L['lin_b'] = p['lin_b'].astype(jnp.float32)
    return packed


# ----------------------------------- main --------------------------------------
if __name__ == "__main__":
    key = jax.random.PRNGKey(0)
    kp, kx = jax.random.split(key)
    params = init_params(kp)
    packed = pack_params(params)              # weight packing once, outside jit
    mix = jax.random.normal(kx, (2, 128), dtype=jnp.float32)  # [B, L]

    out, y = unet2_forward(packed, mix)
    out = jax.block_until_ready(out)
    assert out.shape == (2, 128), out.shape
    assert y is None
    assert bool(jnp.all(jnp.isfinite(out)))
    print("KERNEL_OK")
</pallas_src>

<mosaic_0001>
module attributes {stable_mosaic.version = 11 : i64} {
  func.func @kernel(%arg0: i32, %arg1: memref<2x128xf32, #tpu.memory_space<vmem>>, %arg2: memref<2x128xf32, #tpu.memory_space<vmem>>, %arg3: memref<128x128xbf16, #tpu.memory_space<vmem>>, %arg4: memref<128x128xbf16, #tpu.memory_space<vmem>>, %arg5: memref<2x128xf32, #tpu.memory_space<vmem>>) attributes {dimension_semantics = [#tpu.dimension_semantics<parallel>], iteration_bounds = array<i64: 2>, scalar_prefetch = 0 : i64, scratch_operands = 0 : i64, tpu.core_type = #tpu.core_type<tc>, window_params = [{transform_indices = @transform_0, window_bounds = array<i64: 2, 128>}, {transform_indices = @transform_1, window_bounds = array<i64: 2, 128>}, {pipeline_mode = #tpu.pipeline_mode<synchronous>, transform_indices = @transform_2, window_bounds = array<i64: 128, 128>}, {pipeline_mode = #tpu.pipeline_mode<synchronous>, transform_indices = @transform_3, window_bounds = array<i64: 128, 128>}, {transform_indices = @transform_4, window_bounds = array<i64: 2, 128>}]} {
    %c0 = arith.constant 0 : index
    %c0_0 = arith.constant 0 : index
    %0 = vector.load %arg1[%c0, %c0_0] : memref<2x128xf32, #tpu.memory_space<vmem>>, vector<2x128xf32>
    %1 = arith.truncf %0 : vector<2x128xf32> to vector<2x128xbf16>
    %c0_1 = arith.constant 0 : index
    %c0_2 = arith.constant 0 : index
    %2 = vector.load %arg2[%c0_1, %c0_2] : memref<2x128xf32, #tpu.memory_space<vmem>>, vector<2x128xf32>
    %3 = arith.truncf %2 : vector<2x128xf32> to vector<2x128xbf16>
    %c0_3 = arith.constant 0 : index
    %c0_4 = arith.constant 0 : index
    %4 = vector.load %arg3[%c0_3, %c0_4] : memref<128x128xbf16, #tpu.memory_space<vmem>>, vector<128x128xbf16>
    %cst = arith.constant dense<0.000000e+00> : vector<2x128xf32>
    %5 = tpu.matmul %1, %4, %cst {dimension_numbers = #tpu.dot_dimension_numbers<[1], [0], [0], [1], [0, 0, 1, 1], [], []>} : vector<2x128xbf16>, vector<128x128xbf16>, vector<2x128xf32> -> vector<2x128xf32>
    %c0_5 = arith.constant 0 : index
    %c0_6 = arith.constant 0 : index
    %6 = vector.load %arg4[%c0_5, %c0_6] : memref<128x128xbf16, #tpu.memory_space<vmem>>, vector<128x128xbf16>
    %cst_7 = arith.constant dense<0.000000e+00> : vector<2x128xf32>
    %7 = tpu.matmul %3, %6, %cst_7 {dimension_numbers = #tpu.dot_dimension_numbers<[1], [0], [0], [1], [0, 0, 1, 1], [], []>} : vector<2x128xbf16>, vector<128x128xbf16>, vector<2x128xf32> -> vector<2x128xf32>
    %8 = arith.addf %5, %7 : vector<2x128xf32>
    %c0_8 = arith.constant 0 : index
    %c0_9 = arith.constant 0 : index
    %9 = vector.load %arg5[%c0_8, %c0_9] : memref<2x128xf32, #tpu.memory_space<vmem>>, vector<2x128xf32>
    tpu.vector_store %arg5[%c0_8, %c0_9], %8 {strides = array<i32>} : memref<2x128xf32, #tpu.memory_space<vmem>>, vector<2x128xf32>,
    return
  }
  func.func @transform_0(%arg0: i32) -> (i32, i32) {
    %c0_i32 = arith.constant 0 : i32
    %c0_i32_0 = arith.constant 0 : i32
    return %c0_i32, %arg0 : i32, i32
  }
  func.func @transform_1(%arg0: i32) -> (i32, i32) {
    %c1_i32 = arith.constant 1 : i32
    %0 = arith.addi %arg0, %c1_i32 : i32
    %c0_i32 = arith.constant 0 : i32
    %c0_i32_0 = arith.constant 0 : i32
    return %c0_i32, %0 : i32, i32
  }
  func.func @transform_2(%arg0: i32) -> (i32, i32) {
    %c0_i32 = arith.constant 0 : i32
    %c0_i32_0 = arith.constant 0 : i32
    %c0_i32_1 = arith.constant 0 : i32
    return %c0_i32, %c0_i32_0 : i32, i32
  }
  func.func @transform_3(%arg0: i32) -> (i32, i32) {
    %c0_i32 = arith.constant 0 : i32
    %c0_i32_0 = arith.constant 0 : i32
    %c0_i32_1 = arith.constant 0 : i32
    return %c0_i32, %c0_i32_0 : i32, i32
  }
  func.func @transform_4(%arg0: i32) -> (i32, i32) {
    %c0_i32 = arith.constant 0 : i32
    %c0_i32_0 = arith.constant 0 : i32
    return %c0_i32, %arg0 : i32, i32
  }
}

module attributes {stable_mosaic.version = 11 : i64} {
  func.func @kernel(%arg0: i32, %arg1: memref<1x4x256xf32, #tpu.memory_space<vmem>>, %arg2: memref<16x4xbf16, #tpu.memory_space<vmem>>, %arg3: memref<16x4xbf16, #tpu.memory_space<vmem>>, %arg4: memref<16x1xf32, #tpu.memory_space<vmem>>, %arg5: memref<16x16xbf16, #tpu.memory_space<vmem>>, %arg6: memref<16x1xf32, #tpu.memory_space<vmem>>, %arg7: memref<1x16x128xf32, #tpu.memory_space<vmem>>) attributes {dimension_semantics = [#tpu.dimension_semantics<parallel>], iteration_bounds = array<i64: 2>, scalar_prefetch = 0 : i64, scratch_operands = 0 : i64, tpu.core_type = #tpu.core_type<tc>, window_params = [{transform_indices = @transform_0, window_bounds = array<i64: 1, 4, 256>}, {pipeline_mode = #tpu.pipeline_mode<synchronous>, transform_indices = @transform_1, window_bounds = array<i64: 16, 4>}, {pipeline_mode = #tpu.pipeline_mode<synchronous>, transform_indices = @transform_2, window_bounds = array<i64: 16, 4>}, {pipeline_mode = #tpu.pipeline_mode<synchronous>, transform_indices = @transform_3, window_bounds = array<i64: 16, 1>}, {pipeline_mode = #tpu.pipeline_mode<synchronous>, transform_indices = @transform_4, window_bounds = array<i64: 16, 16>}, {pipeline_mode = #tpu.pipeline_mode<synchronous>, transform_indices = @transform_5, window_bounds = array<i64: 16, 1>}, {transform_indices = @transform_6, window_bounds = array<i64: 1, 16, 128>}]} {
    %c0 = arith.constant 0 : index
    %c0_0 = arith.constant 0 : index
    %c0_1 = arith.constant 0 : index
    %0 = vector.load %arg1[%c0, %c0_0, %c0_1] : memref<1x4x256xf32, #tpu.memory_space<vmem>>, vector<1x4x256xf32>
    %1 = vector.shape_cast %0 : vector<1x4x256xf32> to vector<4x256xf32>
    %c255_i32 = arith.constant 255 : i32
    %2 = tpu.dynamic_rotate %1 by %c255_i32 dim 1 : vector<4x256xf32>, i32 -> vector<4x256xf32>
    %3 = vector.extract_strided_slice %1 {offsets = [0, 0], sizes = [4, 128], strides = [1, 1]} : vector<4x256xf32> to vector<4x128xf32>
    %4 = arith.truncf %3 : vector<4x128xf32> to vector<4x128xbf16>
    %5 = vector.extract_strided_slice %2 {offsets = [0, 0], sizes = [4, 128], strides = [1, 1]} : vector<4x256xf32> to vector<4x128xf32>
    %6 = arith.truncf %5 : vector<4x128xf32> to vector<4x128xbf16>
    %c0_2 = arith.constant 0 : index
    %c0_3 = arith.constant 0 : index
    %7 = vector.load %arg2[%c0_2, %c0_3] : memref<16x4xbf16, #tpu.memory_space<vmem>>, vector<16x4xbf16>
    %cst = arith.constant dense<0.000000e+00> : vector<16x128xf32>
    %8 = tpu.matmul %7, %4, %cst {dimension_numbers = #tpu.dot_dimension_numbers<[1], [0], [0], [1], [0, 0, 1, 1], [], []>} : vector<16x4xbf16>, vector<4x128xbf16>, vector<16x128xf32> -> vector<16x128xf32>
    %c0_4 = arith.constant 0 : index
    %c0_5 = arith.constant 0 : index
    %9 = vector.load %arg3[%c0_4, %c0_5] : memref<16x4xbf16, #tpu.memory_space<vmem>>, vector<16x4xbf16>
    %cst_6 = arith.constant dense<0.000000e+00> : vector<16x128xf32>
    %10 = tpu.matmul %9, %6, %cst_6 {dimension_numbers = #tpu.dot_dimension_numbers<[1], [0], [0], [1], [0, 0, 1, 1], [], []>} : vector<16x4xbf16>, vector<4x128xbf16>, vector<16x128xf32> -> vector<16x128xf32>
    %11 = arith.addf %8, %10 : vector<16x128xf32>
    %c0_7 = arith.constant 0 : index
    %c0_8 = arith.constant 0 : index
    %12 = vector.load %arg4[%c0_7, %c0_8] : memref<16x1xf32, #tpu.memory_space<vmem>>, vector<16x1xf32>
    %13 = vector.broadcast %12 : vector<16x1xf32> to vector<16x128xf32>
    %14 = arith.addf %11, %13 : vector<16x128xf32>
    %cst_9 = arith.constant 0.000000e+00 : f32
    %15 = vector.broadcast %cst_9 : f32 to vector<16x128xf32>
    %16 = arith.maximumf %14, %15 : vector<16x128xf32>
    %c0_10 = arith.constant 0 : index
    %c0_11 = arith.constant 0 : index
    %17 = vector.load %arg5[%c0_10, %c0_11] : memref<16x16xbf16, #tpu.memory_space<vmem>>, vector<16x16xbf16>
    %18 = arith.truncf %16 : vector<16x128xf32> to vector<16x128xbf16>
    %cst_12 = arith.constant dense<0.000000e+00> : vector<16x128xf32>
    %19 = tpu.matmul %17, %18, %cst_12 {dimension_numbers = #tpu.dot_dimension_numbers<[1], [0], [0], [1], [0, 0, 1, 1], [], []>} : vector<16x16xbf16>, vector<16x128xbf16>, vector<16x128xf32> -> vector<16x128xf32>
    %c0_13 = arith.constant 0 : index
    %c0_14 = arith.constant 0 : index
    %20 = vector.load %arg6[%c0_13, %c0_14] : memref<16x1xf32, #tpu.memory_space<vmem>>, vector<16x1xf32>
    %21 = vector.broadcast %20 : vector<16x1xf32> to vector<16x128xf32>
    %22 = arith.addf %19, %21 : vector<16x128xf32>
    %cst_15 = arith.constant 0.000000e+00 : f32
    %23 = vector.broadcast %cst_15 : f32 to vector<16x128xf32>
    %24 = arith.maximumf %22, %23 : vector<16x128xf32>
    %c0_16 = arith.constant 0 : index
    %c0_17 = arith.constant 0 : index
    %c0_18 = arith.constant 0 : index
    %25 = vector.load %arg7[%c0_16, %c0_17, %c0_18] : memref<1x16x128xf32, #tpu.memory_space<vmem>>, vector<1x16x128xf32>
    %26 = vector.shape_cast %25 : vector<1x16x128xf32> to vector<16x128xf32>
    %27 = vector.shape_cast %24 : vector<16x128xf32> to vector<1x16x128xf32>
    tpu.vector_store %arg7[%c0_16, %c0_17, %c0_18], %27 {strides = array<i32>} : memref<1x16x128xf32, #tpu.memory_space<vmem>>, vector<1x16x128xf32>,
    return
  }
  func.func @transform_0(%arg0: i32) -> (i32, i32, i32) {
    %c0_i32 = arith.constant 0 : i32
    %c0_i32_0 = arith.constant 0 : i32
    %c0_i32_1 = arith.constant 0 : i32
    return %arg0, %c0_i32, %c0_i32_0 : i32, i32, i32
  }
  func.func @transform_1(%arg0: i32) -> (i32, i32) {
    %c0_i32 = arith.constant 0 : i32
    %c0_i32_0 = arith.constant 0 : i32
    %c0_i32_1 = arith.constant 0 : i32
    return %c0_i32, %c0_i32_0 : i32, i32
  }
  func.func @transform_2(%arg0: i32) -> (i32, i32) {
    %c0_i32 = arith.constant 0 : i32
    %c0_i32_0 = arith.constant 0 : i32
    %c0_i32_1 = arith.constant 0 : i32
    return %c0_i32, %c0_i32_0 : i32, i32
  }
  func.func @transform_3(%arg0: i32) -> (i32, i32) {
    %c0_i32 = arith.constant 0 : i32
    %c0_i32_0 = arith.constant 0 : i32
    %c0_i32_1 = arith.constant 0 : i32
    return %c0_i32, %c0_i32_0 : i32, i32
  }
  func.func @transform_4(%arg0: i32) -> (i32, i32) {
    %c0_i32 = arith.constant 0 : i32
    %c0_i32_0 = arith.constant 0 : i32
    %c0_i32_1 = arith.constant 0 : i32
    return %c0_i32, %c0_i32_0 : i32, i32
  }
  func.func @transform_5(%arg0: i32) -> (i32, i32) {
    %c0_i32 = arith.constant 0 : i32
    %c0_i32_0 = arith.constant 0 : i32
    %c0_i32_1 = arith.constant 0 : i32
    return %c0_i32, %c0_i32_0 : i32, i32
  }
  func.func @transform_6(%arg0: i32) -> (i32, i32, i32) {
    %c0_i32 = arith.constant 0 : i32
    %c0_i32_0 = arith.constant 0 : i32
    %c0_i32_1 = arith.constant 0 : i32
    return %arg0, %c0_i32, %c0_i32_0 : i32, i32, i32
  }
}

module attributes {stable_mosaic.version = 11 : i64} {
  func.func @kernel(%arg0: i32, %arg1: memref<1x64x256xf32, #tpu.memory_space<vmem>>, %arg2: memref<32x64xbf16, #tpu.memory_space<vmem>>, %arg3: memref<32x64xbf16, #tpu.memory_space<vmem>>, %arg4: memref<32x1xf32, #tpu.memory_space<vmem>>, %arg5: memref<32x32xbf16, #tpu.memory_space<vmem>>, %arg6: memref<32x1xf32, #tpu.memory_space<vmem>>, %arg7: memref<1x32x128xf32, #tpu.memory_space<vmem>>) attributes {dimension_semantics = [#tpu.dimension_semantics<parallel>], iteration_bounds = array<i64: 2>, scalar_prefetch = 0 : i64, scratch_operands = 0 : i64, tpu.core_type = #tpu.core_type<tc>, window_params = [{transform_indices = @transform_0, window_bounds = array<i64: 1, 64, 256>}, {pipeline_mode = #tpu.pipeline_mode<synchronous>, transform_indices = @transform_1, window_bounds = array<i64: 32, 64>}, {pipeline_mode = #tpu.pipeline_mode<synchronous>, transform_indices = @transform_2, window_bounds = array<i64: 32, 64>}, {pipeline_mode = #tpu.pipeline_mode<synchronous>, transform_indices = @transform_3, window_bounds = array<i64: 32, 1>}, {pipeline_mode = #tpu.pipeline_mode<synchronous>, transform_indices = @transform_4, window_bounds = array<i64: 32, 32>}, {pipeline_mode = #tpu.pipeline_mode<synchronous>, transform_indices = @transform_5, window_bounds = array<i64: 32, 1>}, {transform_indices = @transform_6, window_bounds = array<i64: 1, 32, 128>}]} {
    %c0 = arith.constant 0 : index
    %c0_0 = arith.constant 0 : index
    %c0_1 = arith.constant 0 : index
    %0 = vector.load %arg1[%c0, %c0_0, %c0_1] : memref<1x64x256xf32, #tpu.memory_space<vmem>>, vector<1x64x256xf32>
    %1 = vector.shape_cast %0 : vector<1x64x256xf32> to vector<64x256xf32>
    %c255_i32 = arith.constant 255 : i32
    %2 = tpu.dynamic_rotate %1 by %c255_i32 dim 1 : vector<64x256xf32>, i32 -> vector<64x256xf32>
    %3 = vector.extract_strided_slice %1 {offsets = [0, 0], sizes = [64, 128], strides = [1, 1]} : vector<64x256xf32> to vector<64x128xf32>
    %4 = arith.truncf %3 : vector<64x128xf32> to vector<64x128xbf16>
    %5 = vector.extract_strided_slice %2 {offsets = [0, 0], sizes = [64, 128], strides = [1, 1]} : vector<64x256xf32> to vector<64x128xf32>
    %6 = arith.truncf %5 : vector<64x128xf32> to vector<64x128xbf16>
    %c0_2 = arith.constant 0 : index
    %c0_3 = arith.constant 0 : index
    %7 = vector.load %arg2[%c0_2, %c0_3] : memref<32x64xbf16, #tpu.memory_space<vmem>>, vector<32x64xbf16>
    %cst = arith.constant dense<0.000000e+00> : vector<32x128xf32>
    %8 = tpu.matmul %7, %4, %cst {dimension_numbers = #tpu.dot_dimension_numbers<[1], [0], [0], [1], [0, 0, 1, 1], [], []>} : vector<32x64xbf16>, vector<64x128xbf16>, vector<32x128xf32> -> vector<32x128xf32>
    %c0_4 = arith.constant 0 : index
    %c0_5 = arith.constant 0 : index
    %9 = vector.load %arg3[%c0_4, %c0_5] : memref<32x64xbf16, #tpu.memory_space<vmem>>, vector<32x64xbf16>
    %cst_6 = arith.constant dense<0.000000e+00> : vector<32x128xf32>
    %10 = tpu.matmul %9, %6, %cst_6 {dimension_numbers = #tpu.dot_dimension_numbers<[1], [0], [0], [1], [0, 0, 1, 1], [], []>} : vector<32x64xbf16>, vector<64x128xbf16>, vector<32x128xf32> -> vector<32x128xf32>
    %11 = arith.addf %8, %10 : vector<32x128xf32>
    %c0_7 = arith.constant 0 : index
    %c0_8 = arith.constant 0 : index
    %12 = vector.load %arg4[%c0_7, %c0_8] : memref<32x1xf32, #tpu.memory_space<vmem>>, vector<32x1xf32>
    %13 = vector.broadcast %12 : vector<32x1xf32> to vector<32x128xf32>
    %14 = arith.addf %11, %13 : vector<32x128xf32>
    %cst_9 = arith.constant 0.000000e+00 : f32
    %15 = vector.broadcast %cst_9 : f32 to vector<32x128xf32>
    %16 = arith.maximumf %14, %15 : vector<32x128xf32>
    %c0_10 = arith.constant 0 : index
    %c0_11 = arith.constant 0 : index
    %17 = vector.load %arg5[%c0_10, %c0_11] : memref<32x32xbf16, #tpu.memory_space<vmem>>, vector<32x32xbf16>
    %18 = arith.truncf %16 : vector<32x128xf32> to vector<32x128xbf16>
    %cst_12 = arith.constant dense<0.000000e+00> : vector<32x128xf32>
    %19 = tpu.matmul %17, %18, %cst_12 {dimension_numbers = #tpu.dot_dimension_numbers<[1], [0], [0], [1], [0, 0, 1, 1], [], []>} : vector<32x32xbf16>, vector<32x128xbf16>, vector<32x128xf32> -> vector<32x128xf32>
    %c0_13 = arith.constant 0 : index
    %c0_14 = arith.constant 0 : index
    %20 = vector.load %arg6[%c0_13, %c0_14] : memref<32x1xf32, #tpu.memory_space<vmem>>, vector<32x1xf32>
    %21 = vector.broadcast %20 : vector<32x1xf32> to vector<32x128xf32>
    %22 = arith.addf %19, %21 : vector<32x128xf32>
    %cst_15 = arith.constant 0.000000e+00 : f32
    %23 = vector.broadcast %cst_15 : f32 to vector<32x128xf32>
    %24 = arith.maximumf %22, %23 : vector<32x128xf32>
    %c0_16 = arith.constant 0 : index
    %c0_17 = arith.constant 0 : index
    %c0_18 = arith.constant 0 : index
    %25 = vector.load %arg7[%c0_16, %c0_17, %c0_18] : memref<1x32x128xf32, #tpu.memory_space<vmem>>, vector<1x32x128xf32>
    %26 = vector.shape_cast %25 : vector<1x32x128xf32> to vector<32x128xf32>
    %27 = vector.shape_cast %24 : vector<32x128xf32> to vector<1x32x128xf32>
    tpu.vector_store %arg7[%c0_16, %c0_17, %c0_18], %27 {strides = array<i32>} : memref<1x32x128xf32, #tpu.memory_space<vmem>>, vector<1x32x128xf32>,
    return
  }
  func.func @transform_0(%arg0: i32) -> (i32, i32, i32) {
    %c0_i32 = arith.constant 0 : i32
    %c0_i32_0 = arith.constant 0 : i32
    %c0_i32_1 = arith.constant 0 : i32
    return %arg0, %c0_i32, %c0_i32_0 : i32, i32, i32
  }
  func.func @transform_1(%arg0: i32) -> (i32, i32) {
    %c0_i32 = arith.constant 0 : i32
    %c0_i32_0 = arith.constant 0 : i32
    %c0_i32_1 = arith.constant 0 : i32
    return %c0_i32, %c0_i32_0 : i32, i32
  }
  func.func @transform_2(%arg0: i32) -> (i32, i32) {
    %c0_i32 = arith.constant 0 : i32
    %c0_i32_0 = arith.constant 0 : i32
    %c0_i32_1 = arith.constant 0 : i32
    return %c0_i32, %c0_i32_0 : i32, i32
  }
  func.func @transform_3(%arg0: i32) -> (i32, i32) {
    %c0_i32 = arith.constant 0 : i32
    %c0_i32_0 = arith.constant 0 : i32
    %c0_i32_1 = arith.constant 0 : i32
    return %c0_i32, %c0_i32_0 : i32, i32
  }
  func.func @transform_4(%arg0: i32) -> (i32, i32) {
    %c0_i32 = arith.constant 0 : i32
    %c0_i32_0 = arith.constant 0 : i32
    %c0_i32_1 = arith.constant 0 : i32
    return %c0_i32, %c0_i32_0 : i32, i32
  }
  func.func @transform_5(%arg0: i32) -> (i32, i32) {
    %c0_i32 = arith.constant 0 : i32
    %c0_i32_0 = arith.constant 0 : i32
    %c0_i32_1 = arith.constant 0 : i32
    return %c0_i32, %c0_i32_0 : i32, i32
  }
  func.func @transform_6(%arg0: i32) -> (i32, i32, i32) {
    %c0_i32 = arith.constant 0 : i32
    %c0_i32_0 = arith.constant 0 : i32
    %c0_i32_1 = arith.constant 0 : i32
    return %arg0, %c0_i32, %c0_i32_0 : i32, i32, i32
  }
}

module attributes {stable_mosaic.version = 11 : i64} {
  func.func @_lstm_rec_kernel(%arg0: memref<15x2x512xf32, #tpu.memory_space<vmem>>, %arg1: memref<15x2x512xf32, #tpu.memory_space<vmem>>, %arg2: memref<64x512xf32, #tpu.memory_space<vmem>>, %arg3: memref<1x512xf32, #tpu.memory_space<vmem>>, %arg4: memref<15x2x64xf32, #tpu.memory_space<vmem>>, %arg5: memref<15x2x64xf32, #tpu.memory_space<vmem>>) attributes {dimension_semantics = [], scalar_prefetch = 0 : i64, scratch_operands = 0 : i64, tpu.core_type = #tpu.core_type<tc>} {
    %cst = arith.constant 0.000000e+00 : f32
    %0 = vector.broadcast %cst : f32 to vector<2x128xf32>
    %cst_0 = arith.constant 0.000000e+00 : f32
    %1 = vector.broadcast %cst_0 : f32 to vector<2x128xf32>
    %c0_i32 = arith.constant 0 : i32
    %c15_i32 = arith.constant 15 : i32
    %2 = arith.addi %c0_i32, %c15_i32 : i32
    %c1_i32 = arith.constant 1 : i32
    %3:2 = scf.for %arg6 = %c0_i32 to %2 step %c1_i32 iter_args(%arg7 = %0, %arg8 = %1) -> (vector<2x128xf32>, vector<2x128xf32>)  : i32 {
      %c14_i32 = arith.constant 14 : i32
      %4 = arith.subi %c14_i32, %arg6 : i32
      %5 = arith.index_cast %arg6 : i32 to index
      %c0 = arith.constant 0 : index
      %c0_2 = arith.constant 0 : index
      %6 = vector.load %arg0[%5, %c0, %c0_2] : memref<15x2x512xf32, #tpu.memory_space<vmem>>, vector<1x2x512xf32>
      %7 = vector.shape_cast %6 : vector<1x2x512xf32> to vector<2x512xf32>
      %8 = arith.index_cast %4 : i32 to index
      %c0_3 = arith.constant 0 : index
      %c0_4 = arith.constant 0 : index
      %9 = vector.load %arg1[%8, %c0_3, %c0_4] : memref<15x2x512xf32, #tpu.memory_space<vmem>>, vector<1x2x512xf32>
      %10 = vector.shape_cast %9 : vector<1x2x512xf32> to vector<2x512xf32>
      %11 = arith.addf %7, %10 : vector<2x512xf32>
      %12 = vector.extract_strided_slice %arg7 {offsets = [0, 0], sizes = [2, 64], strides = [1, 1]} : vector<2x128xf32> to vector<2x64xf32>
      %c0_5 = arith.constant 0 : index
      %c0_6 = arith.constant 0 : index
      %13 = vector.load %arg2[%c0_5, %c0_6] : memref<64x512xf32, #tpu.memory_space<vmem>>, vector<64x512xf32>
      %cst_7 = arith.constant dense<0.000000e+00> : vector<2x512xf32>
      %14 = tpu.matmul %12, %13, %cst_7 {dimension_numbers = #tpu.dot_dimension_numbers<[1], [0], [0], [1], [0, 0, 1, 1], [], []>} : vector<2x64xf32>, vector<64x512xf32>, vector<2x512xf32> -> vector<2x512xf32>
      %15 = arith.addf %11, %14 : vector<2x512xf32>
      %c0_8 = arith.constant 0 : index
      %c0_9 = arith.constant 0 : index
      %16 = vector.load %arg3[%c0_8, %c0_9] : memref<1x512xf32, #tpu.memory_space<vmem>>, vector<1x512xf32>
      %17 = vector.broadcast %16 : vector<1x512xf32> to vector<2x512xf32>
      %18 = arith.addf %15, %17 : vector<2x512xf32>
      %19 = vector.extract_strided_slice %18 {offsets = [0, 0], sizes = [2, 128], strides = [1, 1]} : vector<2x512xf32> to vector<2x128xf32>
      %cst_10 = arith.constant 0.000000e+00 : f32
      %20 = vector.broadcast %cst_10 : f32 to vector<2x128xf32>
      %21 = arith.subf %20, %19 : vector<2x128xf32>
      %22 = math.exp %21 : vector<2x128xf32>
      %cst_11 = arith.constant 1.000000e+00 : f32
      %23 = vector.broadcast %cst_11 : f32 to vector<2x128xf32>
      %24 = arith.addf %23, %22 : vector<2x128xf32>
      %25 = tpu.reciprocal %24 {approx = true} : vector<2x128xf32> -> vector<2x128xf32>
      %26 = vector.extract_strided_slice %18 {offsets = [0, 128], sizes = [2, 128], strides = [1, 1]} : vector<2x512xf32> to vector<2x128xf32>
      %cst_12 = arith.constant 0.000000e+00 : f32
      %27 = vector.broadcast %cst_12 : f32 to vector<2x128xf32>
      %28 = arith.subf %27, %26 : vector<2x128xf32>
      %29 = math.exp %28 : vector<2x128xf32>
      %cst_13 = arith.constant 1.000000e+00 : f32
      %30 = vector.broadcast %cst_13 : f32 to vector<2x128xf32>
      %31 = arith.addf %30, %29 : vector<2x128xf32>
      %32 = tpu.reciprocal %31 {approx = true} : vector<2x128xf32> -> vector<2x128xf32>
      %33 = vector.extract_strided_slice %18 {offsets = [0, 256], sizes = [2, 128], strides = [1, 1]} : vector<2x512xf32> to vector<2x128xf32>
      %34 = math.tanh %33 : vector<2x128xf32>
      %35 = vector.extract_strided_slice %18 {offsets = [0, 384], sizes = [2, 128], strides = [1, 1]} : vector<2x512xf32> to vector<2x128xf32>
      %cst_14 = arith.constant 0.000000e+00 : f32
      %36 = vector.broadcast %cst_14 : f32 to vector<2x128xf32>
      %37 = arith.subf %36, %35 : vector<2x128xf32>
      %38 = math.exp %37 : vector<2x128xf32>
      %cst_15 = arith.constant 1.000000e+00 : f32
      %39 = vector.broadcast %cst_15 : f32 to vector<2x128xf32>
      %40 = arith.addf %39, %38 : vector<2x128xf32>
      %41 = tpu.reciprocal %40 {approx = true} : vector<2x128xf32> -> vector<2x128xf32>
      %42 = arith.mulf %32, %arg8 : vector<2x128xf32>
      %43 = arith.mulf %25, %34 : vector<2x128xf32>
      %44 = arith.addf %42, %43 : vector<2x128xf32>
      %45 = math.tanh %44 : vector<2x128xf32>
      %46 = arith.mulf %41, %45 : vector<2x128xf32>
      %47 = vector.extract_strided_slice %46 {offsets = [0, 0], sizes = [2, 64], strides = [1, 1]} : vector<2x128xf32> to vector<2x64xf32>
      %48 = arith.index_cast %arg6 : i32 to index
      %c0_16 = arith.constant 0 : index
      %c0_17 = arith.constant 0 : index
      %49 = vector.load %arg4[%48, %c0_16, %c0_17] : memref<15x2x64xf32, #tpu.memory_space<vmem>>, vector<1x2x64xf32>
      %50 = vector.shape_cast %49 : vector<1x2x64xf32> to vector<2x64xf32>
      %51 = vector.shape_cast %47 : vector<2x64xf32> to vector<1x2x64xf32>
      tpu.vector_store %arg4[%48, %c0_16, %c0_17], %51 {strides = array<i32>} : memref<15x2x64xf32, #tpu.memory_space<vmem>>, vector<1x2x64xf32>,
      %52 = arith.index_cast %4 : i32 to index
      %c0_18 = arith.constant 0 : index
      %c0_19 = arith.constant 0 : index
      %53 = vector.load %arg5[%52, %c0_18, %c0_19] : memref<15x2x64xf32, #tpu.memory_space<vmem>>, vector<1x2x64xf32>
      %54 = vector.shape_cast %53 : vector<1x2x64xf32> to vector<2x64xf32>
      %55 = vector.shape_cast %47 : vector<2x64xf32> to vector<1x2x64xf32>
      tpu.vector_store %arg5[%52, %c0_18, %c0_19], %55 {strides = array<i32>} : memref<15x2x64xf32, #tpu.memory_space<vmem>>, vector<1x2x64xf32>,
      scf.yield %46, %44 : vector<2x128xf32>, vector<2x128xf32>
    }
    %c15_i32_1 = arith.constant 15 : i32
    return
  }
}

module attributes {stable_mosaic.version = 11 : i64} {
  func.func @kernel(%arg0: i32, %arg1: memref<1x32x128xf32, #tpu.memory_space<vmem>>, %arg2: memref<1x32x128xf32, #tpu.memory_space<vmem>>, %arg3: memref<32x32xbf16, #tpu.memory_space<vmem>>, %arg4: memref<32x1xf32, #tpu.memory_space<vmem>>, %arg5: memref<64x32xbf16, #tpu.memory_space<vmem>>, %arg6: memref<64x32xbf16, #tpu.memory_space<vmem>>, %arg7: memref<64x1xf32, #tpu.memory_space<vmem>>, %arg8: memref<1x64x128xf32, #tpu.memory_space<vmem>>) attributes {dimension_semantics = [#tpu.dimension_semantics<parallel>], iteration_bounds = array<i64: 2>, scalar_prefetch = 0 : i64, scratch_operands = 0 : i64, tpu.core_type = #tpu.core_type<tc>, window_params = [{transform_indices = @transform_0, window_bounds = array<i64: 1, 32, 128>}, {transform_indices = @transform_1, window_bounds = array<i64: 1, 32, 128>}, {pipeline_mode = #tpu.pipeline_mode<synchronous>, transform_indices = @transform_2, window_bounds = array<i64: 32, 32>}, {pipeline_mode = #tpu.pipeline_mode<synchronous>, transform_indices = @transform_3, window_bounds = array<i64: 32, 1>}, {pipeline_mode = #tpu.pipeline_mode<synchronous>, transform_indices = @transform_4, window_bounds = array<i64: 64, 32>}, {pipeline_mode = #tpu.pipeline_mode<synchronous>, transform_indices = @transform_5, window_bounds = array<i64: 64, 32>}, {pipeline_mode = #tpu.pipeline_mode<synchronous>, transform_indices = @transform_6, window_bounds = array<i64: 64, 1>}, {transform_indices = @transform_7, window_bounds = array<i64: 1, 64, 128>}]} {
    %c0 = arith.constant 0 : index
    %c0_0 = arith.constant 0 : index
    %c0_1 = arith.constant 0 : index
    %0 = vector.load %arg1[%c0, %c0_0, %c0_1] : memref<1x32x128xf32, #tpu.memory_space<vmem>>, vector<1x32x128xf32>
    %1 = vector.shape_cast %0 : vector<1x32x128xf32> to vector<32x128xf32>
    %c0_2 = arith.constant 0 : index
    %c0_3 = arith.constant 0 : index
    %c0_4 = arith.constant 0 : index
    %2 = vector.load %arg2[%c0_2, %c0_3, %c0_4] : memref<1x32x128xf32, #tpu.memory_space<vmem>>, vector<1x32x128xf32>
    %3 = vector.shape_cast %2 : vector<1x32x128xf32> to vector<32x128xf32>
    %4 = arith.addf %1, %3 : vector<32x128xf32>
    %c0_5 = arith.constant 0 : index
    %c0_6 = arith.constant 0 : index
    %5 = vector.load %arg3[%c0_5, %c0_6] : memref<32x32xbf16, #tpu.memory_space<vmem>>, vector<32x32xbf16>
    %6 = arith.truncf %4 : vector<32x128xf32> to vector<32x128xbf16>
    %cst = arith.constant dense<0.000000e+00> : vector<32x128xf32>
    %7 = tpu.matmul %5, %6, %cst {dimension_numbers = #tpu.dot_dimension_numbers<[1], [0], [0], [1], [0, 0, 1, 1], [], []>} : vector<32x32xbf16>, vector<32x128xbf16>, vector<32x128xf32> -> vector<32x128xf32>
    %c0_7 = arith.constant 0 : index
    %c0_8 = arith.constant 0 : index
    %8 = vector.load %arg4[%c0_7, %c0_8] : memref<32x1xf32, #tpu.memory_space<vmem>>, vector<32x1xf32>
    %9 = vector.broadcast %8 : vector<32x1xf32> to vector<32x128xf32>
    %10 = arith.addf %7, %9 : vector<32x128xf32>
    %cst_9 = arith.constant 0.000000e+00 : f32
    %11 = vector.broadcast %cst_9 : f32 to vector<32x128xf32>
    %12 = arith.maximumf %10, %11 : vector<32x128xf32>
    %13 = tpu.iota {dimensions = array<i32: 1>} : vector<32x128xi32>
    %c15_i32 = arith.constant 15 : i32
    %14 = vector.broadcast %c15_i32 : i32 to vector<32x128xi32>
    %15 = arith.cmpi slt, %13, %14 : vector<32x128xi32>
    %cst_10 = arith.constant 0.000000e+00 : f32
    %16 = vector.broadcast %cst_10 : f32 to vector<32x128xf32>
    %17 = arith.select %15, %12, %16 : vector<32x128xi1>, vector<32x128xf32>
    %18 = arith.truncf %17 : vector<32x128xf32> to vector<32x128xbf16>
    %c0_11 = arith.constant 0 : index
    %c0_12 = arith.constant 0 : index
    %19 = vector.load %arg5[%c0_11, %c0_12] : memref<64x32xbf16, #tpu.memory_space<vmem>>, vector<64x32xbf16>
    %cst_13 = arith.constant dense<0.000000e+00> : vector<64x128xf32>
    %20 = tpu.matmul %19, %18, %cst_13 {dimension_numbers = #tpu.dot_dimension_numbers<[1], [0], [0], [1], [0, 0, 1, 1], [], []>} : vector<64x32xbf16>, vector<32x128xbf16>, vector<64x128xf32> -> vector<64x128xf32>
    %c0_14 = arith.constant 0 : index
    %c0_15 = arith.constant 0 : index
    %21 = vector.load %arg6[%c0_14, %c0_15] : memref<64x32xbf16, #tpu.memory_space<vmem>>, vector<64x32xbf16>
    %cst_16 = arith.constant dense<0.000000e+00> : vector<64x128xf32>
    %22 = tpu.matmul %21, %18, %cst_16 {dimension_numbers = #tpu.dot_dimension_numbers<[1], [0], [0], [1], [0, 0, 1, 1], [], []>} : vector<64x32xbf16>, vector<32x128xbf16>, vector<64x128xf32> -> vector<64x128xf32>
    %c1_i32 = arith.constant 1 : i32
    %23 = tpu.dynamic_rotate %22 by %c1_i32 dim 1 : vector<64x128xf32>, i32 -> vector<64x128xf32>
    %24 = arith.addf %20, %23 : vector<64x128xf32>
    %c0_17 = arith.constant 0 : index
    %c0_18 = arith.constant 0 : index
    %25 = vector.load %arg7[%c0_17, %c0_18] : memref<64x1xf32, #tpu.memory_space<vmem>>, vector<64x1xf32>
    %26 = vector.broadcast %25 : vector<64x1xf32> to vector<64x128xf32>
    %27 = arith.addf %24, %26 : vector<64x128xf32>
    %cst_19 = arith.constant 0.000000e+00 : f32
    %28 = vector.broadcast %cst_19 : f32 to vector<64x128xf32>
    %29 = arith.maximumf %27, %28 : vector<64x128xf32>
    %c0_20 = arith.constant 0 : index
    %c0_21 = arith.constant 0 : index
    %c0_22 = arith.constant 0 : index
    %30 = vector.load %arg8[%c0_20, %c0_21, %c0_22] : memref<1x64x128xf32, #tpu.memory_space<vmem>>, vector<1x64x128xf32>
    %31 = vector.shape_cast %30 : vector<1x64x128xf32> to vector<64x128xf32>
    %32 = vector.shape_cast %29 : vector<64x128xf32> to vector<1x64x128xf32>
    tpu.vector_store %arg8[%c0_20, %c0_21, %c0_22], %32 {strides = array<i32>} : memref<1x64x128xf32, #tpu.memory_space<vmem>>, vector<1x64x128xf32>,
    return
  }
  func.func @transform_0(%arg0: i32) -> (i32, i32, i32) {
    %c0_i32 = arith.constant 0 : i32
    %c0_i32_0 = arith.constant 0 : i32
    %c0_i32_1 = arith.constant 0 : i32
    return %arg0, %c0_i32, %c0_i32_0 : i32, i32, i32
  }
  func.func @transform_1(%arg0: i32) -> (i32, i32, i32) {
    %c0_i32 = arith.constant 0 : i32
    %c0_i32_0 = arith.constant 0 : i32
    %c0_i32_1 = arith.constant 0 : i32
    return %arg0, %c0_i32, %c0_i32_0 : i32, i32, i32
  }
  func.func @transform_2(%arg0: i32) -> (i32, i32) {
    %c0_i32 = arith.constant 0 : i32
    %c0_i32_0 = arith.constant 0 : i32
    %c0_i32_1 = arith.constant 0 : i32
    return %c0_i32, %c0_i32_0 : i32, i32
  }
  func.func @transform_3(%arg0: i32) -> (i32, i32) {
    %c0_i32 = arith.constant 0 : i32
    %c0_i32_0 = arith.constant 0 : i32
    %c0_i32_1 = arith.constant 0 : i32
    return %c0_i32, %c0_i32_0 : i32, i32
  }
  func.func @transform_4(%arg0: i32) -> (i32, i32) {
    %c0_i32 = arith.constant 0 : i32
    %c0_i32_0 = arith.constant 0 : i32
    %c0_i32_1 = arith.constant 0 : i32
    return %c0_i32, %c0_i32_0 : i32, i32
  }
  func.func @transform_5(%arg0: i32) -> (i32, i32) {
    %c0_i32 = arith.constant 0 : i32
    %c0_i32_0 = arith.constant 0 : i32
    %c0_i32_1 = arith.constant 0 : i32
    return %c0_i32, %c0_i32_0 : i32, i32
  }
  func.func @transform_6(%arg0: i32) -> (i32, i32) {
    %c0_i32 = arith.constant 0 : i32
    %c0_i32_0 = arith.constant 0 : i32
    %c0_i32_1 = arith.constant 0 : i32
    return %c0_i32, %c0_i32_0 : i32, i32
  }
  func.func @transform_7(%arg0: i32) -> (i32, i32, i32) {
    %c0_i32 = arith.constant 0 : i32
    %c0_i32_0 = arith.constant 0 : i32
    %c0_i32_1 = arith.constant 0 : i32
    return %arg0, %c0_i32, %c0_i32_0 : i32, i32, i32
  }
}

module attributes {stable_mosaic.version = 11 : i64} {
  func.func @kernel(%arg0: i32, %arg1: memref<1x16x128xf32, #tpu.memory_space<vmem>>, %arg2: memref<1x16x128xf32, #tpu.memory_space<vmem>>, %arg3: memref<16x16xbf16, #tpu.memory_space<vmem>>, %arg4: memref<16x1xf32, #tpu.memory_space<vmem>>, %arg5: memref<4x16xbf16, #tpu.memory_space<vmem>>, %arg6: memref<4x16xbf16, #tpu.memory_space<vmem>>, %arg7: memref<4x1xf32, #tpu.memory_space<vmem>>, %arg8: memref<1x4x128xf32, #tpu.memory_space<vmem>>) attributes {dimension_semantics = [#tpu.dimension_semantics<parallel>], iteration_bounds = array<i64: 2>, scalar_prefetch = 0 : i64, scratch_operands = 0 : i64, tpu.core_type = #tpu.core_type<tc>, window_params = [{transform_indices = @transform_0, window_bounds = array<i64: 1, 16, 128>}, {transform_indices = @transform_1, window_bounds = array<i64: 1, 16, 128>}, {pipeline_mode = #tpu.pipeline_mode<synchronous>, transform_indices = @transform_2, window_bounds = array<i64: 16, 16>}, {pipeline_mode = #tpu.pipeline_mode<synchronous>, transform_indices = @transform_3, window_bounds = array<i64: 16, 1>}, {pipeline_mode = #tpu.pipeline_mode<synchronous>, transform_indices = @transform_4, window_bounds = array<i64: 4, 16>}, {pipeline_mode = #tpu.pipeline_mode<synchronous>, transform_indices = @transform_5, window_bounds = array<i64: 4, 16>}, {pipeline_mode = #tpu.pipeline_mode<synchronous>, transform_indices = @transform_6, window_bounds = array<i64: 4, 1>}, {transform_indices = @transform_7, window_bounds = array<i64: 1, 4, 128>}]} {
    %c0 = arith.constant 0 : index
    %c0_0 = arith.constant 0 : index
    %c0_1 = arith.constant 0 : index
    %0 = vector.load %arg1[%c0, %c0_0, %c0_1] : memref<1x16x128xf32, #tpu.memory_space<vmem>>, vector<1x16x128xf32>
    %1 = vector.shape_cast %0 : vector<1x16x128xf32> to vector<16x128xf32>
    %c0_2 = arith.constant 0 : index
    %c0_3 = arith.constant 0 : index
    %c0_4 = arith.constant 0 : index
    %2 = vector.load %arg2[%c0_2, %c0_3, %c0_4] : memref<1x16x128xf32, #tpu.memory_space<vmem>>, vector<1x16x128xf32>
    %3 = vector.shape_cast %2 : vector<1x16x128xf32> to vector<16x128xf32>
    %4 = arith.addf %1, %3 : vector<16x128xf32>
    %c0_5 = arith.constant 0 : index
    %c0_6 = arith.constant 0 : index
    %5 = vector.load %arg3[%c0_5, %c0_6] : memref<16x16xbf16, #tpu.memory_space<vmem>>, vector<16x16xbf16>
    %6 = arith.truncf %4 : vector<16x128xf32> to vector<16x128xbf16>
    %cst = arith.constant dense<0.000000e+00> : vector<16x128xf32>
    %7 = tpu.matmul %5, %6, %cst {dimension_numbers = #tpu.dot_dimension_numbers<[1], [0], [0], [1], [0, 0, 1, 1], [], []>} : vector<16x16xbf16>, vector<16x128xbf16>, vector<16x128xf32> -> vector<16x128xf32>
    %c0_7 = arith.constant 0 : index
    %c0_8 = arith.constant 0 : index
    %8 = vector.load %arg4[%c0_7, %c0_8] : memref<16x1xf32, #tpu.memory_space<vmem>>, vector<16x1xf32>
    %9 = vector.broadcast %8 : vector<16x1xf32> to vector<16x128xf32>
    %10 = arith.addf %7, %9 : vector<16x128xf32>
    %cst_9 = arith.constant 0.000000e+00 : f32
    %11 = vector.broadcast %cst_9 : f32 to vector<16x128xf32>
    %12 = arith.maximumf %10, %11 : vector<16x128xf32>
    %13 = tpu.iota {dimensions = array<i32: 1>} : vector<16x128xi32>
    %c64_i32 = arith.constant 64 : i32
    %14 = vector.broadcast %c64_i32 : i32 to vector<16x128xi32>
    %15 = arith.cmpi slt, %13, %14 : vector<16x128xi32>
    %cst_10 = arith.constant 0.000000e+00 : f32
    %16 = vector.broadcast %cst_10 : f32 to vector<16x128xf32>
    %17 = arith.select %15, %12, %16 : vector<16x128xi1>, vector<16x128xf32>
    %18 = arith.truncf %17 : vector<16x128xf32> to vector<16x128xbf16>
    %c0_11 = arith.constant 0 : index
    %c0_12 = arith.constant 0 : index
    %19 = vector.load %arg5[%c0_11, %c0_12] : memref<4x16xbf16, #tpu.memory_space<vmem>>, vector<4x16xbf16>
    %cst_13 = arith.constant dense<0.000000e+00> : vector<4x128xf32>
    %20 = tpu.matmul %19, %18, %cst_13 {dimension_numbers = #tpu.dot_dimension_numbers<[1], [0], [0], [1], [0, 0, 1, 1], [], []>} : vector<4x16xbf16>, vector<16x128xbf16>, vector<4x128xf32> -> vector<4x128xf32>
    %c0_14 = arith.constant 0 : index
    %c0_15 = arith.constant 0 : index
    %21 = vector.load %arg6[%c0_14, %c0_15] : memref<4x16xbf16, #tpu.memory_space<vmem>>, vector<4x16xbf16>
    %cst_16 = arith.constant dense<0.000000e+00> : vector<4x128xf32>
    %22 = tpu.matmul %21, %18, %cst_16 {dimension_numbers = #tpu.dot_dimension_numbers<[1], [0], [0], [1], [0, 0, 1, 1], [], []>} : vector<4x16xbf16>, vector<16x128xbf16>, vector<4x128xf32> -> vector<4x128xf32>
    %c1_i32 = arith.constant 1 : i32
    %23 = tpu.dynamic_rotate %22 by %c1_i32 dim 1 : vector<4x128xf32>, i32 -> vector<4x128xf32>
    %24 = arith.addf %20, %23 : vector<4x128xf32>
    %c0_17 = arith.constant 0 : index
    %c0_18 = arith.constant 0 : index
    %25 = vector.load %arg7[%c0_17, %c0_18] : memref<4x1xf32, #tpu.memory_space<vmem>>, vector<4x1xf32>
    %26 = vector.broadcast %25 : vector<4x1xf32> to vector<4x128xf32>
    %27 = arith.addf %24, %26 : vector<4x128xf32>
    %c0_19 = arith.constant 0 : index
    %c0_20 = arith.constant 0 : index
    %c0_21 = arith.constant 0 : index
    %28 = vector.load %arg8[%c0_19, %c0_20, %c0_21] : memref<1x4x128xf32, #tpu.memory_space<vmem>>, vector<1x4x128xf32>
    %29 = vector.shape_cast %28 : vector<1x4x128xf32> to vector<4x128xf32>
    %30 = vector.shape_cast %27 : vector<4x128xf32> to vector<1x4x128xf32>
    tpu.vector_store %arg8[%c0_19, %c0_20, %c0_21], %30 {strides = array<i32>} : memref<1x4x128xf32, #tpu.memory_space<vmem>>, vector<1x4x128xf32>,
    return
  }
  func.func @transform_0(%arg0: i32) -> (i32, i32, i32) {
    %c0_i32 = arith.constant 0 : i32
    %c0_i32_0 = arith.constant 0 : i32
    %c0_i32_1 = arith.constant 0 : i32
    return %arg0, %c0_i32, %c0_i32_0 : i32, i32, i32
  }
  func.func @transform_1(%arg0: i32) -> (i32, i32, i32) {
    %c0_i32 = arith.constant 0 : i32
    %c0_i32_0 = arith.constant 0 : i32
    %c0_i32_1 = arith.constant 0 : i32
    return %arg0, %c0_i32, %c0_i32_0 : i32, i32, i32
  }
  func.func @transform_2(%arg0: i32) -> (i32, i32) {
    %c0_i32 = arith.constant 0 : i32
    %c0_i32_0 = arith.constant 0 : i32
    %c0_i32_1 = arith.constant 0 : i32
    return %c0_i32, %c0_i32_0 : i32, i32
  }
  func.func @transform_3(%arg0: i32) -> (i32, i32) {
    %c0_i32 = arith.constant 0 : i32
    %c0_i32_0 = arith.constant 0 : i32
    %c0_i32_1 = arith.constant 0 : i32
    return %c0_i32, %c0_i32_0 : i32, i32
  }
  func.func @transform_4(%arg0: i32) -> (i32, i32) {
    %c0_i32 = arith.constant 0 : i32
    %c0_i32_0 = arith.constant 0 : i32
    %c0_i32_1 = arith.constant 0 : i32
    return %c0_i32, %c0_i32_0 : i32, i32
  }
  func.func @transform_5(%arg0: i32) -> (i32, i32) {
    %c0_i32 = arith.constant 0 : i32
    %c0_i32_0 = arith.constant 0 : i32
    %c0_i32_1 = arith.constant 0 : i32
    return %c0_i32, %c0_i32_0 : i32, i32
  }
  func.func @transform_6(%arg0: i32) -> (i32, i32) {
    %c0_i32 = arith.constant 0 : i32
    %c0_i32_0 = arith.constant 0 : i32
    %c0_i32_1 = arith.constant 0 : i32
    return %c0_i32, %c0_i32_0 : i32, i32
  }
  func.func @transform_7(%arg0: i32) -> (i32, i32, i32) {
    %c0_i32 = arith.constant 0 : i32
    %c0_i32_0 = arith.constant 0 : i32
    %c0_i32_1 = arith.constant 0 : i32
    return %arg0, %c0_i32, %c0_i32_0 : i32, i32, i32
  }
}

module attributes {stable_mosaic.version = 11 : i64} {
  func.func @kernel(%arg0: i32, %arg1: memref<2x128xf32, #tpu.memory_space<vmem>>, %arg2: memref<2x128xf32, #tpu.memory_space<vmem>>, %arg3: memref<128x128xbf16, #tpu.memory_space<vmem>>, %arg4: memref<128x128xbf16, #tpu.memory_space<vmem>>, %arg5: memref<2x128xf32, #tpu.memory_space<vmem>>, %arg6: memref<2x128xf32, #tpu.memory_space<vmem>>) attributes {dimension_semantics = [#tpu.dimension_semantics<parallel>], iteration_bounds = array<i64: 2>, scalar_prefetch = 0 : i64, scratch_operands = 0 : i64, tpu.core_type = #tpu.core_type<tc>, window_params = [{transform_indices = @transform_0, window_bounds = array<i64: 2, 128>}, {transform_indices = @transform_1, window_bounds = array<i64: 2, 128>}, {pipeline_mode = #tpu.pipeline_mode<synchronous>, transform_indices = @transform_2, window_bounds = array<i64: 128, 128>}, {pipeline_mode = #tpu.pipeline_mode<synchronous>, transform_indices = @transform_3, window_bounds = array<i64: 128, 128>}, {transform_indices = @transform_4, window_bounds = array<i64: 2, 128>}, {transform_indices = @transform_5, window_bounds = array<i64: 2, 128>}]} {
    %c0 = arith.constant 0 : index
    %c0_0 = arith.constant 0 : index
    %0 = vector.load %arg1[%c0, %c0_0] : memref<2x128xf32, #tpu.memory_space<vmem>>, vector<2x128xf32>
    %1 = arith.truncf %0 : vector<2x128xf32> to vector<2x128xbf16>
    %c0_1 = arith.constant 0 : index
    %c0_2 = arith.constant 0 : index
    %2 = vector.load %arg2[%c0_1, %c0_2] : memref<2x128xf32, #tpu.memory_space<vmem>>, vector<2x128xf32>
    %3 = arith.truncf %2 : vector<2x128xf32> to vector<2x128xbf16>
    %c0_3 = arith.constant 0 : index
    %c0_4 = arith.constant 0 : index
    %4 = vector.load %arg3[%c0_3, %c0_4] : memref<128x128xbf16, #tpu.memory_space<vmem>>, vector<128x128xbf16>
    %cst = arith.constant dense<0.000000e+00> : vector<2x128xf32>
    %5 = tpu.matmul %1, %4, %cst {dimension_numbers = #tpu.dot_dimension_numbers<[1], [0], [0], [1], [0, 0, 1, 1], [], []>} : vector<2x128xbf16>, vector<128x128xbf16>, vector<2x128xf32> -> vector<2x128xf32>
    %c0_5 = arith.constant 0 : index
    %c0_6 = arith.constant 0 : index
    %6 = vector.load %arg4[%c0_5, %c0_6] : memref<128x128xbf16, #tpu.memory_space<vmem>>, vector<128x128xbf16>
    %cst_7 = arith.constant dense<0.000000e+00> : vector<2x128xf32>
    %7 = tpu.matmul %3, %6, %cst_7 {dimension_numbers = #tpu.dot_dimension_numbers<[1], [0], [0], [1], [0, 0, 1, 1], [], []>} : vector<2x128xbf16>, vector<128x128xbf16>, vector<2x128xf32> -> vector<2x128xf32>
    %8 = arith.addf %5, %7 : vector<2x128xf32>
    %c0_8 = arith.constant 0 : index
    %c0_9 = arith.constant 0 : index
    %9 = vector.load %arg5[%c0_8, %c0_9] : memref<2x128xf32, #tpu.memory_space<vmem>>, vector<2x128xf32>
    %10 = arith.addf %8, %9 : vector<2x128xf32>
    %cst_10 = arith.constant 5.000000e-01 : f32
    %11 = vector.broadcast %cst_10 : f32 to vector<2x128xf32>
    %12 = arith.mulf %10, %11 : vector<2x128xf32>
    %c0_11 = arith.constant 0 : index
    %c0_12 = arith.constant 0 : index
    %13 = vector.load %arg6[%c0_11, %c0_12] : memref<2x128xf32, #tpu.memory_space<vmem>>, vector<2x128xf32>
    tpu.vector_store %arg6[%c0_11, %c0_12], %12 {strides = array<i32>} : memref<2x128xf32, #tpu.memory_space<vmem>>, vector<2x128xf32>,
    return
  }
  func.func @transform_0(%arg0: i32) -> (i32, i32) {
    %c0_i32 = arith.constant 0 : i32
    %c0_i32_0 = arith.constant 0 : i32
    return %c0_i32, %arg0 : i32, i32
  }
  func.func @transform_1(%arg0: i32) -> (i32, i32) {
    %c1_i32 = arith.constant 1 : i32
    %0 = arith.addi %arg0, %c1_i32 : i32
    %c0_i32 = arith.constant 0 : i32
    %c0_i32_0 = arith.constant 0 : i32
    return %c0_i32, %0 : i32, i32
  }
  func.func @transform_2(%arg0: i32) -> (i32, i32) {
    %c0_i32 = arith.constant 0 : i32
    %c0_i32_0 = arith.constant 0 : i32
    %c0_i32_1 = arith.constant 0 : i32
    return %c0_i32, %c0_i32_0 : i32, i32
  }
  func.func @transform_3(%arg0: i32) -> (i32, i32) {
    %c0_i32 = arith.constant 0 : i32
    %c0_i32_0 = arith.constant 0 : i32
    %c0_i32_1 = arith.constant 0 : i32
    return %c0_i32, %c0_i32_0 : i32, i32
  }
  func.func @transform_4(%arg0: i32) -> (i32, i32) {
    %c0_i32 = arith.constant 0 : i32
    %c0_i32_0 = arith.constant 0 : i32
    return %c0_i32, %arg0 : i32, i32
  }
  func.func @transform_5(%arg0: i32) -> (i32, i32) {
    %c0_i32 = arith.constant 0 : i32
    %c0_i32_0 = arith.constant 0 : i32
    return %c0_i32, %arg0 : i32, i32
  }
}

</mosaic_0001>

<bundles_post_ra>
// kernel: unet2_forward.8
= control target key start
LH: loop header
LB: loop body
LE: loop exit
PB: predicated region body
PF: predicated region fallthrough
CT: control target
= control target key end

     0   :  { %s642_s15 = smov 0   ;;  %s717_s0 = inlined_call_operand.vmem [shape: f32[2,384], index: 0, kind: input, shape index: {}, may-alias: {0,1}]   ;;  %s718_s1 = inlined_call_operand.vmem [shape: f32[2,384], index: 1, kind: input, shape index: {}, may-alias: {0,1}]   ;;  %s719_s2 = inlined_call_operand.vmem [shape: bf16[128,128], index: 2, kind: input, shape index: {}]   ;;  %s720_s3 = inlined_call_operand.vmem [shape: bf16[128,128], index: 3, kind: input, shape index: {}]   ;;  %s721_s4 = inlined_call_operand.vmem [shape: f32[2,256], index: 4, kind: output, shape index: {}]  }
   0x1 LB: > { %s648_s16 = sadd.s32 4294967295, %s613_s15   ;;  %p500_p0 = scmp.ge.s32.totalorder %s613_s15, 1  ;;  %s613_s15 = sphi %s642_s15, %s14_s15  }
   0x2   : > { %p174_p1 = scmp.lt.s32.totalorder %s613_s15, 3 }
   0x4   : > { %p175_p2 = pnand %p500_p0, %p174_p1 }
   0x5   : > { %v591_v0 = vld [vmem:[%s720_s3] sm:$0xff] (!%p175_p2)   ;;  %v615_v1 = vmov (!%p175_p2), 0.0   ;;  %v593_v3 = vld [vmem:[%s720_s3 + $0x8] sm:$0xff] (!%p175_p2)   ;;  %vm616_vm0 = vmmov (!%p175_p2), 0   ;;  %v595_v5 = vld [vmem:[%s720_s3 + $0x10] sm:$0xff] (!%p175_p2)   ;;  %s207_s29 = sadd.s32 (!%p175_p2), 1, %s648_s16 }
   0x6   : > { %178 = sbr.rel (%p175_p2) target bundleno = 254 (0xfe), region = 36  ;;  %540 = vmatprep.subr.bf16.mxu1 (!%p175_p2), %v615_v1  ;;  %560 = vmatprep.subr.bf16.mxu0 (!%p175_p2), %v615_v1  ;;  %v592_v2 = vld [vmem:[%s719_s2] sm:$0xff] (!%p175_p2)   ;;  %v594_v4 = vld [vmem:[%s719_s2 + $0x8] sm:$0xff] (!%p175_p2)   ;;  %v596_v6 = vld [vmem:[%s719_s2 + $0x10] sm:$0xff] (!%p175_p2)   ;;  %p208_p3 = scmp.lt.s32.totalorder (!%p175_p2), %s207_s29, 2 }
   0x7   : > { %541 = vmatpush3.bf16.msra.mxu1 (!%p175_p2), %v591_v0  ;;  %556 = vmatprep.mubr.msk.bf16.mxu1 (!%p175_p2), %vm616_vm0, %v615_v1  ;;  %v597_v7 = vld [vmem:[%s720_s3 + $0x18] sm:$0xff] (!%p175_p2)   ;;  %p203_p4 = scmp.lt.s32.totalorder (!%p175_p2), %s648_s16, 2  ;;  %v599_v9 = vld [vmem:[%s720_s3 + $0x20] sm:$0xff] (!%p175_p2)   ;;  %v601_v11 = vld [vmem:[%s720_s3 + $0x28] sm:$0xff] (!%p175_p2)   ;;  %p213_p5 = scmp.lt.s32.totalorder (!%p175_p2), %s648_s16, 1 }
   0x8   : > { %561 = vmatpush3.bf16.msra.mxu0 (!%p175_p2), %v592_v2  ;;  %542 = vmatprep.subr.bf16.mxu1 (!%p175_p2), %v615_v1  ;;  %v598_v8 = vld [vmem:[%s719_s2 + $0x18] sm:$0xff] (!%p175_p2)   ;;  %v600_v10 = vld [vmem:[%s719_s2 + $0x20] sm:$0xff] (!%p175_p2)   ;;  %v602_v12 = vld [vmem:[%s719_s2 + $0x28] sm:$0xff] (!%p175_p2)  }
   0x9   : > { %562 = vmatprep.subr.bf16.mxu0 (!%p175_p2), %v615_v1  ;;  %576 = vmatprep.mubr.msk.bf16.mxu0 (!%p175_p2), %vm616_vm0, %v615_v1  ;;  %v603_v13 = vld [vmem:[%s720_s3 + $0x30] sm:$0xff] (!%p175_p2)   ;;  %v605_v15 = vld [vmem:[%s720_s3 + $0x38] sm:$0xff] (!%p175_p2)  }
   0xa   : > { %v604_v14 = vld [vmem:[%s719_s2 + $0x30] sm:$0xff] (!%p175_p2)   ;;  %v606_v17 = vld [vmem:[%s719_s2 + $0x38] sm:$0xff] (!%p175_p2)  }
   0xb   : > { %543 = vmatpush3.bf16.msra.mxu1 (!%p175_p2), %v593_v3 }
   0xc   : > { %563 = vmatpush3.bf16.msra.mxu0 (!%p175_p2), %v594_v4  ;;  %544 = vmatprep.subr.bf16.mxu1 (!%p175_p2), %v615_v1 }
   0xd   : > { %564 = vmatprep.subr.bf16.mxu0 %v615_v1  ;;  %s723_s29 = smov (!%p208_p3, %s207_s29), 2 }
   0xe   : > { %s204_s12 = scalar_select %p203_p4, %s648_s16, 2 }
   0xf   : > { %545 = vmatpush3.bf16.msra.mxu1 %v595_v5  ;;  %s502_s19 = sshll.u32 %s723_s29, 1  ;;  %s725_s16 = smov (!%p213_p5, %s648_s16), 1 }
  0x10   : > { %565 = vmatpush3.bf16.msra.mxu0 %v596_v6  ;;  %546 = vmatprep.subr.bf16.mxu1 %v615_v1  ;;  %s501_s20 = sshll.u32 %s204_s12, 1  ;;  %s211_s27 = scalar_lea.vmem %s718_s1, %s502_s19 }
  0x11   : > { %566 = vmatprep.subr.bf16.mxu0 %v615_v1  ;;  %s206_s29 = scalar_lea.vmem %s717_s0, %s501_s20  ;;  %v220_v16 = vld [vmem:[%s211_s27] sm:$0x3]  ;;  %s503_s9 = sshll.u32 %s725_s16, 1 }
  0x12   : > { %v218_v18 = vld [vmem:[%s206_s29] sm:$0x3]  ;;  %v221_v19 = vpack.c.bf16 %v220_v16, %v220_v16  ;;  %s216_s12 = scalar_lea.vmem %s721_s4, %s503_s9 }
  0x13   : > { %547 = vmatpush3.bf16.msra.mxu1 %v597_v7  ;;  %v219_v20 = vpack.c.bf16 %v218_v18, %v218_v18 }
  0x14   : > { %567 = vmatpush3.bf16.msra.mxu0 %v598_v8  ;;  %548 = vmatprep.subr.bf16.mxu1 %v615_v1 }
  0x15   : > { %568 = vmatprep.subr.bf16.mxu0 %v615_v1 }
  0x17   : > { %549 = vmatpush3.bf16.msra.mxu1 %v599_v9 }
  0x18   : > { %569 = vmatpush3.bf16.msra.mxu0 %v600_v10  ;;  %550 = vmatprep.subr.bf16.mxu1 %v615_v1 }
  0x19   : > { %570 = vmatprep.subr.bf16.mxu0 %v615_v1 }
  0x1b   : > { %551 = vmatpush3.bf16.msra.mxu1 %v601_v11 }
  0x1c   : > { %571 = vmatpush3.bf16.msra.mxu0 %v602_v12  ;;  %552 = vmatprep.subr.bf16.mxu1 %v615_v1 }
  0x1d   : > { %572 = vmatprep.subr.bf16.mxu0 %v615_v1 }
  0x1f   : > { %553 = vmatpush3.bf16.msra.mxu1 %v603_v13 }
  0x20   : > { %573 = vmatpush3.bf16.msra.mxu0 %v604_v14  ;;  %554 = vmatprep.subr.bf16.mxu1 %v615_v1 }
  0x21   : > { %574 = vmatprep.subr.bf16.mxu0 %v615_v1 }
  0x23   : > { %555 = vmatpush3.bf16.msra.mxu1 %v605_v15 }
  0x24   : > { %575 = vmatpush3.bf16.msra.mxu0 %v606_v17 }
  0x26   : > { %557 = vmatmul.mubr.bf16.vlgmr.msra.gmra.mrb[0].mxu1 %v221_v19 }
  0x27   : > { %577 = vmatmul.mubr.bf16.vlgmr.msra.gmra.mrb[0].mxu0 %v219_v20 }
  0xf9   : > { %v336_v21 = vpop.f32.mrb[0].mxu1 }
  0xfa   : > { %v424_v22 = vpop.f32.mrb[0].mxu0  ;;  %v558_v23 = vpop.f32.mrb[1].mxu1 }
  0xfb   : > { %v425_v24 = vadd.f32 %v424_v22, %v336_v21  ;;  %v578_v25 = vpop.f32.mrb[1].mxu0  ;;  %v339_v26 = vpop.f32.mrb[2].mxu1 }
  0xfc   : > { %v427_v27 = vpop.f32.mrb[2].mxu0  ;;  %v559_v28 = vpop.f32.mrb[3].mxu1 }
  0xfd   : > { %430 = vst [vmem:[%s216_s12] sm:$0x3] %v425_v24  ;;  %v579_v29 = vpop.f32.mrb[3].mxu0 }
  0xfe PF: > { %s14_s15 = sadd.s32 1, %s613_s15  }
  0xff   : > { %p11_p6 = scmp.ge.s32.totalorder %s14_s15, 4  }
 0x101   :  { %13 = sbr.rel (!%p11_p6) target bundleno = 1 (0x1), region = 69 }

// kernel: unet2_forward.9
= control target key start
LH: loop header
LB: loop body
LE: loop exit
PB: predicated region body
PF: predicated region fallthrough
CT: control target
= control target key end

     0   :  { %s630_s21 = smov 0   ;;  %s679_s0 = inlined_call_operand.vmem [shape: f32[2,4,256], index: 0, kind: input, shape index: {}]   ;;  %s680_s1 = inlined_call_operand.vmem [shape: bf16[16,4], index: 1, kind: input, shape index: {}]   ;;  %s681_s2 = inlined_call_operand.vmem [shape: bf16[16,4], index: 2, kind: input, shape index: {}]   ;;  %s682_s3 = inlined_call_operand.vmem [shape: f32[16,1], index: 3, kind: input, shape index: {}]   ;;  %s683_s4 = inlined_call_operand.vmem [shape: bf16[16,16], index: 4, kind: input, shape index: {}]   ;;  %s684_s5 = inlined_call_operand.vmem [shape: f32[16,1], index: 5, kind: input, shape index: {}]   ;;  %s685_s6 = inlined_call_operand.vmem [shape: f32[2,16,128], index: 6, kind: output, shape index: {}]  }
   0x1 LB: > { %s517_s22 = sadd.s32 4294967295, %s589_s21   ;;  %p521_p0 = scmp.ge.s32.totalorder %s589_s21, 1  ;;  %s589_s21 = sphi %s630_s21, %s16_s21  }
   0x2   : > { %p212_p1 = scmp.lt.s32.totalorder %s589_s21, 3 }
   0x4   : > { %p213_p2 = pnand %p521_p0, %p212_p1 }
   0x5   : > { %p242_p3 = scmp.lt.s32.totalorder (!%p213_p2), %s517_s22, 1  ;;  %v591_v0 = vmov (!%p213_p2), 0.0   ;;  %vm592_vm0 = vmmov (!%p213_p2), 0   ;;  %vm280_vm1 = vcmask (!%p213_p2), 1041408   ;;  %v378_v4 = vld [vmem:[%s682_s3 + $0x8] sm:$0xff] (!%p213_p2)  ;;  %v593_v5 = vmov (!%p213_p2), 0  }
   0x6   : > { %216 = sbr.rel (%p213_p2) target bundleno = 589 (0x24d), region = 44  ;;  %548 = vmatprep.subr.bf16.mxu1 (!%p213_p2), %v591_v0  ;;  %542 = vmatprep.subr.bf16.mxu0 (!%p213_p2), %v591_v0  ;;  %v580_v8 = vld [vmem:[%s680_s1] sm:$0xff] (!%p213_p2)   ;;  %vm276_vm2 = vcmask (!%p213_p2), 31744   ;;  %s594_s9 = smov (!%p213_p2), 127   ;;  %v397_v11 = vld [vmem:[%s684_s5 + $0x8] sm:$0xff] (!%p213_p2)  ;;  %v261_v12 = vlaneseq (!%p213_p2)  ;;  %vm413_vm4 = vcmask (!%p213_p2), 130048  }
   0x7   : > { %550 = vmatprep.mubr.msk.bf16.mxu1 (!%p213_p2), %vm592_vm0, %v591_v0  ;;  %544 = vmatprep.mubr.msk.bf16.mxu0 (!%p213_p2), %vm592_vm0, %v591_v0  ;;  %v396_v9 = vld [vmem:[%s684_s5] sm:$0xff] (!%p213_p2) }
   0x8   : > { %578 = vset.pattern.permute.xlu1 (!%p213_p2), %v593_v5  ;;  %577 = vset.pattern.permute.xlu0 (!%p213_p2), %v593_v5  ;;  %v377_v10 = vld [vmem:[%s682_s3] sm:$0xff] (!%p213_p2)  ;;  %v262_v13 = vand.u32 (!%p213_p2), 127, %v261_v12 }
   0x9   : > { %386 = vperm.xlu1 (!%p213_p2), %578, %v378_v4   ;;  %v581_v20 = vld [vmem:[%s681_s2] sm:$0xff] (!%p213_p2)  }
   0xa   : > { %vm263_vm3 = vcmp.lt.s32.totalorder (!%p213_p2), %v262_v13, 127  ;;  %v582_v38 = vld [vmem:[%s683_s4] sm:$0xff] (!%p213_p2)  }
   0xd   : > { %s687_s22 = smov (!%p242_p3, %s517_s22), 1  ;;  %400 = vperm.xlu1 %578, %v396_v9  }
   0xe   : > { %s534_s23 = sshll.u32 %s687_s22, 3  ;;  %s535_s18 = sshll.u32 %s687_s22, 4 }
   0xf   : > { %s246_s26 = scalar_lea.vmem %s679_s0, %s534_s23  ;;  %s251_s23 = scalar_lea.vmem %s685_s6, %s535_s18 }
  0x10   : > { %v253_v1 = vld [vmem:[%s246_s26] sm:$0xff] }
  0x11   : > { %v255_v2 = vcombine.high %v253_v1, %v253_v1  ;;  %v265_v3 = vpack.c.bf16 %v253_v1, %v253_v1  ;;  %405 = vperm.xlu1 %578, %v397_v11  }
  0x13   : > { %v572_v6 = vpack.i.bf16 %v255_v2, %v253_v1  ;;  %v334_v7 = vsel %vm280_vm1, %v265_v3, 0 }
  0x14   : > { %549 = vmatpush3.bf16.msra.mxu1 %v334_v7 }
  0x15   : > { %573 = vrot.lane.b32.xlu0 %v572_v6, %s594_s9 }
  0x17   : > { %551 = vmatmul.mubr.msk.bf16.vlgmr.msra.gmra.mrb[0].mxu1 %vm276_vm2, %v580_v8 }
  0x19   : > { %381 = vperm.xlu0 %577, %v377_v10  }
  0x87   : > { %v574_v14 = vpop.permute.xlu0 %573 }
  0x88   : > { %v576_v15 = vunpack.i.h.bf16 %v574_v14  ;;  %v575_v16 = vunpack.i.l.bf16 %v574_v14  ;;  %v387_v33 = vpop.permute.xlu1 %386 }
  0x8a   : > { %v264_v17 = vsel %vm263_vm3, %v575_v16, %v576_v15 }
  0x8b   : > { %v266_v18 = vpack.c.bf16 %v264_v17, %v264_v17 }
  0x8c   : > { %v401_v39 = vpop.permute.xlu1 %400 }
  0x8d   : > { %v282_v19 = vsel %vm280_vm1, %v266_v18, 0 }
  0x8e   : > { %543 = vmatpush3.bf16.msra.mxu0 %v282_v19 }
  0x8f   : > { %554 = vmatprep.subr.bf16.mxu0 %v591_v0 }
  0x90   : > { %v406_v43 = vpop.permute.xlu1 %405 }
  0x91   : > { %545 = vmatmul.mubr.msk.bf16.vlgmr.msra.gmra.mrb[0].mxu0 %vm276_vm2, %v581_v20 }
  0x92   : > { %556 = vmatprep.mubr.msk.bf16.mxu0 %vm592_vm0, %v591_v0 }
  0x98   : > { %v382_v26 = vpop.permute.xlu0 %381 }
  0xea   : > { %v370_v21 = vpop.f32.mrb[0].mxu1 }
  0xeb   : > { %v552_v22 = vpop.f32.mrb[1].mxu1 }
  0xec   : > { %v373_v23 = vpop.f32.mrb[2].mxu1 }
  0xed   : > { %v553_v24 = vpop.f32.mrb[3].mxu1 }
 0x164   : > { %v318_v25 = vpop.f32.mrb[0].mxu0 }
 0x165   : > { %v371_v27 = vadd.f32 %v370_v21, %v318_v25  ;;  %v546_v28 = vpop.f32.mrb[1].mxu0 }
 0x166   : > { %v321_v29 = vpop.f32.mrb[2].mxu0 }
 0x167   : > { %v389_v30 = vadd.f32 %v382_v26, %v371_v27  ;;  %v374_v31 = vadd.f32 %v373_v23, %v321_v29  ;;  %v547_v32 = vpop.f32.mrb[3].mxu0 }
 0x169   : > { %v390_v34 = vadd.f32 %v387_v33, %v374_v31  ;;  %v391_v35 = vmax.f32 %v389_v30, 0.0 }
 0x16b   : > { %v392_v36 = vmax.f32 %v390_v34, 0.0 }
 0x16d   : > { %v395_v37 = vpack.c.bf16 %v392_v36, %v391_v35 }
 0x16f   : > { %555 = vmatpush3.bf16.msra.mxu0 %v395_v37 }
 0x172   : > { %557 = vmatmul.mubr.msk.bf16.vlgmr.msra.gmra.mrb[4].mxu0 %vm413_vm4, %v582_v38 }
 0x245   : > { %v451_v40 = vpop.f32.mrb[4].mxu0 }
 0x246   : > { %v452_v41 = vadd.f32 %v451_v40, %v401_v39  ;;  %v558_v42 = vpop.f32.mrb[5].mxu0 }
 0x247   : > { %v454_v44 = vpop.f32.mrb[6].mxu0 }
 0x248   : > { %v458_v45 = vmax.f32 %v452_v41, 0.0  ;;  %v455_v46 = vadd.f32 %v454_v44, %v406_v43  ;;  %v559_v47 = vpop.f32.mrb[7].mxu0 }
 0x24a   : > { %460 = vst [vmem:[%s251_s23] sm:$0xff] %v458_v45  ;;  %v459_v48 = vmax.f32 %v455_v46, 0.0 }
 0x24c   : > { %461 = vst [vmem:[%s251_s23 + $0x8] sm:$0xff] %v459_v48 }
 0x24d PF: > { %s16_s21 = sadd.s32 1, %s589_s21  }
 0x24e   : > { %p13_p4 = scmp.ge.s32.totalorder %s16_s21, 4  }
 0x250   :  { %15 = sbr.rel (!%p13_p4) target bundleno = 1 (0x1), region = 74 }

// kernel: unet2_forward.10
= control target key start
LH: loop header
LB: loop body
LE: loop exit
PB: predicated region body
PF: predicated region fallthrough
CT: control target
= control target key end

     0   :  { %s830_s21 = smov 0   ;;  %s933_s0 = inlined_call_operand.vmem [shape: f32[2,64,256], index: 0, kind: input, shape index: {}]   ;;  %s934_s1 = inlined_call_operand.vmem [shape: bf16[32,64], index: 1, kind: input, shape index: {}]   ;;  %s935_s2 = inlined_call_operand.vmem [shape: bf16[32,64], index: 2, kind: input, shape index: {}]   ;;  %s936_s3 = inlined_call_operand.vmem [shape: f32[32,1], index: 3, kind: input, shape index: {}]   ;;  %s937_s4 = inlined_call_operand.vmem [shape: bf16[32,32], index: 4, kind: input, shape index: {}]   ;;  %s938_s5 = inlined_call_operand.vmem [shape: f32[32,1], index: 5, kind: input, shape index: {}]   ;;  %s939_s6 = inlined_call_operand.vmem [shape: f32[2,32,128], index: 6, kind: output, shape index: {}]  }
   0x1 LB: > { %s650_s22 = sadd.s32 4294967295, %s791_s21   ;;  %p654_p0 = scmp.ge.s32.totalorder %s791_s21, 1  ;;  %s791_s21 = sphi %s830_s21, %s16_s21  }
   0x2   : > { %p212_p1 = scmp.lt.s32.totalorder %s791_s21, 3 }
   0x4   : > { %p213_p2 = pnand %p654_p0, %p212_p1 }
   0x5   : > { %p242_p3 = scmp.lt.s32.totalorder (!%p213_p2), %s650_s22, 1  ;;  %s793_s27 = smov (!%p213_p2), 127   ;;  %vm338_vm0 = vcmask (!%p213_p2), 523264   ;;  %v779_v26 = vld [vmem:[%s934_s1] sm:$0xff] (!%p213_p2)   ;;  %v780_v30 = vld [vmem:[%s934_s1 + $0x8] sm:$0xff] (!%p213_p2)   ;;  %v794_v32 = vmov (!%p213_p2), 0   ;;  %v301_v40 = vlaneseq (!%p213_p2) }
   0x6   : > { %216 = sbr.rel (%p213_p2) target bundleno = 611 (0x263), region = 44  ;;  %711 = vmatprep.mubr.msk.bf16.mxu0 (!%p213_p2), %vm338_vm0, %v779_v26  ;;  %v781_v29 = vld [vmem:[%s935_s2] sm:$0xff] (!%p213_p2)   ;;  %v460_v31 = vld [vmem:[%s936_s3 + $0x8] sm:$0xff] (!%p213_p2)  ;;  %778 = vset.pattern.permute.xlu1 (!%p213_p2), %v794_v32  ;;  %v461_v34 = vld [vmem:[%s936_s3 + $0x10] sm:$0xff] (!%p213_p2)  ;;  %vm531_vm2 = vcmask (!%p213_p2), 261120  }
   0x7   : > { %699 = vmatprep.mubr.msk.bf16.mxu1 (!%p213_p2), %vm338_vm0, %v781_v29  ;;  %v459_v33 = vld [vmem:[%s936_s3] sm:$0xff] (!%p213_p2)  ;;  %777 = vset.pattern.permute.xlu0 (!%p213_p2), %v794_v32  ;;  %v462_v35 = vld [vmem:[%s936_s3 + $0x18] sm:$0xff] (!%p213_p2)  ;;  %v498_v37 = vld [vmem:[%s938_s5 + $0x8] sm:$0xff] (!%p213_p2)  ;;  %v302_v43 = vand.u32 (!%p213_p2), 127, %v301_v40 }
   0x8   : > { %v497_v36 = vld [vmem:[%s938_s5] sm:$0xff] (!%p213_p2)  ;;  %v499_v38 = vld [vmem:[%s938_s5 + $0x10] sm:$0xff] (!%p213_p2)  ;;  %v500_v39 = vld [vmem:[%s938_s5 + $0x18] sm:$0xff] (!%p213_p2) }
   0x9   : > { %vm303_vm1 = vcmp.lt.s32.totalorder (!%p213_p2), %v302_v43, 127 }
   0xd   : > { %s941_s22 = smov (!%p242_p3, %s650_s22), 1 }
   0xe   : > { %s673_s23 = sshll.u32 %s941_s22, 7  ;;  %s674_s10 = sshll.u32 %s941_s22, 5 }
   0xf   : > { %s844_s26 = scalar_lea.vmem %s933_s0, %s673_s23  ;;  %s251_s13 = scalar_lea.vmem %s939_s6, %s674_s10 }
  0x10   : > { %v257_v0 = vld [vmem:[%s844_s26 + $0x20] sm:$0xff]  ;;  %v259_v1 = vld [vmem:[%s844_s26 + $0x30] sm:$0xff]  ;;  %v258_v5 = vld [vmem:[%s844_s26 + $0x28] sm:$0xff] }
  0x11   : > { %v253_v2 = vld [vmem:[%s844_s26] sm:$0xff]  ;;  %v747_v3 = vpack.i.bf16 %v259_v1, %v257_v0  ;;  %v255_v4 = vld [vmem:[%s844_s26 + $0x10] sm:$0xff]  ;;  %v260_v6 = vld [vmem:[%s844_s26 + $0x38] sm:$0xff]  ;;  %v313_v7 = vpack.c.bf16 %v259_v1, %v257_v0 }
  0x12   : > { %v737_v8 = vpack.i.bf16 %v255_v4, %v253_v2  ;;  %v254_v9 = vld [vmem:[%s844_s26 + $0x8] sm:$0xff]  ;;  %v256_v10 = vld [vmem:[%s844_s26 + $0x18] sm:$0xff]  ;;  %v312_v11 = vpack.c.bf16 %v255_v4, %v253_v2  ;;  %v752_v12 = vpack.i.bf16 %v260_v6, %v258_v5  ;;  %v261_v16 = vld [vmem:[%s844_s26 + $0x40] sm:$0xff] }
  0x13   : > { %748 = vrot.lane.b32.xlu1 %v747_v3, %s793_s27  ;;  %v742_v13 = vpack.i.bf16 %v256_v10, %v254_v9  ;;  %v262_v14 = vld [vmem:[%s844_s26 + $0x48] sm:$0xff]  ;;  %v264_v15 = vld [vmem:[%s844_s26 + $0x58] sm:$0xff]  ;;  %v263_v17 = vld [vmem:[%s844_s26 + $0x50] sm:$0xff] }
  0x14   : > { %738 = vrot.lane.b32.xlu0 %v737_v8, %s793_s27  ;;  %703 = vmatprep.subr.bf16.mxu0 %v312_v11  ;;  %v314_v18 = vpack.c.bf16 %v263_v17, %v261_v16  ;;  %v762_v19 = vpack.i.bf16 %v264_v15, %v262_v14  ;;  %v757_v20 = vpack.i.bf16 %v263_v17, %v261_v16  ;;  %v266_v21 = vld [vmem:[%s844_s26 + $0x68] sm:$0xff]  ;;  %v268_v22 = vld [vmem:[%s844_s26 + $0x78] sm:$0xff]  ;;  %v265_v23 = vld [vmem:[%s844_s26 + $0x60] sm:$0xff] }
  0x15   : > { %704 = vmatpush3.bf16.msra.mxu0 %v312_v11  ;;  %v267_v24 = vld [vmem:[%s844_s26 + $0x70] sm:$0xff]  ;;  %v772_v27 = vpack.i.bf16 %v268_v22, %v266_v21  ;;  %v782_v14 = vld [vmem:[%s935_s2 + $0x8] sm:$0xff]  }
  0x16   : > { %705 = vmatprep.subr.bf16.mxu0 %v313_v7  ;;  %v315_v25 = vpack.c.bf16 %v267_v24, %v265_v23  ;;  %v767_v28 = vpack.i.bf16 %v267_v24, %v265_v23 }
  0x17   : > { %753 = vrot.lane.b32.xlu1 %v752_v12, %s793_s27 }
  0x18   : > { %743 = vrot.lane.b32.xlu0 %v742_v13, %s793_s27 }
  0x19   : > { %706 = vmatpush3.bf16.msra.mxu0 %v313_v7 }
  0x1a   : > { %707 = vmatprep.subr.bf16.mxu0 %v314_v18 }
  0x1b   : > { %763 = vrot.lane.b32.xlu1 %v762_v19, %s793_s27  ;;  %v783_v19 = vld [vmem:[%s937_s4] sm:$0xff]  }
  0x1c   : > { %758 = vrot.lane.b32.xlu0 %v757_v20, %s793_s27 }
  0x1d   : > { %708 = vmatpush3.bf16.msra.mxu0 %v314_v18 }
  0x1e   : > { %709 = vmatprep.subr.bf16.mxu0 %v315_v25 }
  0x1f   : > { %773 = vrot.lane.b32.xlu1 %v772_v27, %s793_s27 }
  0x20   : > { %768 = vrot.lane.b32.xlu0 %v767_v28, %s793_s27 }
  0x21   : > { %710 = vmatpush3.bf16.msra.mxu0 %v315_v25 }
  0x23   : > { %470 = vperm.xlu1 %778, %v460_v31  }
  0x24   : > { %712 = vmatmul.mubr.msk.bf16.vlgmr.msra.gmra.mrb[0].mxu0 %vm338_vm0, %v780_v30  ;;  %465 = vperm.xlu0 %777, %v459_v33  }
  0x27   : > { %475 = vperm.xlu1 %778, %v461_v34  }
  0x28   : > { %480 = vperm.xlu0 %777, %v462_v35  }
  0x2b   : > { %503 = vperm.xlu1 %778, %v497_v36  }
  0x2c   : > { %508 = vperm.xlu0 %777, %v498_v37  }
  0x2f   : > { %513 = vperm.xlu1 %778, %v499_v38  }
  0x30   : > { %518 = vperm.xlu0 %777, %v500_v39  }
  0x85   : > { %v749_v41 = vpop.permute.xlu1 %748 }
  0x86   : > { %v739_v42 = vpop.permute.xlu0 %738  ;;  %v751_v44 = vunpack.i.h.bf16 %v749_v41  ;;  %v750_v45 = vunpack.i.l.bf16 %v749_v41 }
  0x87   : > { %v741_v50 = vunpack.i.h.bf16 %v739_v42  ;;  %v740_v51 = vunpack.i.l.bf16 %v739_v42  ;;  %v784_v42 = vld [vmem:[%s937_s4 + $0x8] sm:$0xff]  }
  0x89   : > { %v754_v46 = vpop.permute.xlu1 %753 }
  0x8a   : > { %v756_v47 = vunpack.i.h.bf16 %v754_v46  ;;  %v755_v48 = vunpack.i.l.bf16 %v754_v46  ;;  %v744_v49 = vpop.permute.xlu0 %743 }
  0x8b   : > { %v746_v52 = vunpack.i.h.bf16 %v744_v49  ;;  %v745_v53 = vunpack.i.l.bf16 %v744_v49 }
  0x8c   : > { %v306_v57 = vsel %vm303_vm1, %v750_v45, %v755_v48  ;;  %v307_v58 = vsel %vm303_vm1, %v751_v44, %v756_v47 }
  0x8d   : > { %v304_v54 = vsel %vm303_vm1, %v740_v51, %v745_v53  ;;  %v305_v55 = vsel %vm303_vm1, %v741_v50, %v746_v52  ;;  %v764_v56 = vpop.permute.xlu1 %763  ;;  %v317_v1 = vpack.c.bf16 %v307_v58, %v306_v57 }
  0x8e   : > { %v316_v59 = vpack.c.bf16 %v305_v55, %v304_v54  ;;  %v766_v60 = vunpack.i.h.bf16 %v764_v56  ;;  %v765_v61 = vunpack.i.l.bf16 %v764_v56  ;;  %v759_v62 = vpop.permute.xlu0 %758 }
  0x8f   : > { %v761_v63 = vunpack.i.h.bf16 %v759_v62  ;;  %v760_v0 = vunpack.i.l.bf16 %v759_v62 }
  0x90   : > { %691 = vmatprep.subr.bf16.mxu1 %v316_v59 }
  0x91   : > { %692 = vmatpush3.bf16.msra.mxu1 %v316_v59  ;;  %v774_v2 = vpop.permute.xlu1 %773  ;;  %v308_v3 = vsel %vm303_vm1, %v760_v0, %v765_v61  ;;  %v309_v4 = vsel %vm303_vm1, %v761_v63, %v766_v60 }
  0x92   : > { %693 = vmatprep.subr.bf16.mxu1 %v317_v1  ;;  %v776_v5 = vunpack.i.h.bf16 %v774_v2  ;;  %v775_v6 = vunpack.i.l.bf16 %v774_v2  ;;  %v769_v7 = vpop.permute.xlu0 %768  ;;  %v318_v8 = vpack.c.bf16 %v309_v4, %v308_v3 }
  0x93   : > { %v771_v9 = vunpack.i.h.bf16 %v769_v7  ;;  %v770_v10 = vunpack.i.l.bf16 %v769_v7 }
  0x95   : > { %694 = vmatpush3.bf16.msra.mxu1 %v317_v1  ;;  %v310_v11 = vsel %vm303_vm1, %v770_v10, %v775_v6  ;;  %v311_v12 = vsel %vm303_vm1, %v771_v9, %v776_v5 }
  0x96   : > { %695 = vmatprep.subr.bf16.mxu1 %v318_v8  ;;  %v319_v13 = vpack.c.bf16 %v311_v12, %v310_v11 }
  0x99   : > { %696 = vmatpush3.bf16.msra.mxu1 %v318_v8 }
  0x9a   : > { %697 = vmatprep.subr.bf16.mxu1 %v319_v13 }
  0x9d   : > { %698 = vmatpush3.bf16.msra.mxu1 %v319_v13 }
  0xa0   : > { %700 = vmatmul.mubr.msk.bf16.vlgmr.msra.gmra.mrb[0].mxu1 %vm338_vm0, %v782_v14 }
  0xa1   : > { %719 = vmatprep.mubr.msk.bf16.mxu1 %vm531_vm2, %v783_v19 }
  0xa2   : > { %v471_v20 = vpop.permute.xlu1 %470 }
  0xa3   : > { %v466_v21 = vpop.permute.xlu0 %465 }
  0xa6   : > { %v476_v25 = vpop.permute.xlu1 %475 }
  0xa7   : > { %v481_v31 = vpop.permute.xlu0 %480 }
  0xaa   : > { %v504_v43 = vpop.permute.xlu1 %503 }
  0xab   : > { %v509_v44 = vpop.permute.xlu0 %508 }
  0xae   : > { %v514_v45 = vpop.permute.xlu1 %513 }
  0xaf   : > { %v519_v49 = vpop.permute.xlu0 %518 }
  0xf7   : > { %v713_v15 = vpop.f32.mrb[0].mxu0 }
  0xf8   : > { %v444_v16 = vpop.f32.mrb[1].mxu0 }
  0xf9   : > { %v714_v17 = vpop.f32.mrb[2].mxu0 }
  0xfa   : > { %v447_v18 = vpop.f32.mrb[3].mxu0 }
 0x173   : > { %v701_v22 = vpop.f32.mrb[0].mxu1 }
 0x174   : > { %v453_v23 = vadd.f32 %v713_v15, %v701_v22  ;;  %v379_v24 = vpop.f32.mrb[1].mxu1 }
 0x175   : > { %v445_v26 = vadd.f32 %v444_v16, %v379_v24  ;;  %v702_v27 = vpop.f32.mrb[2].mxu1 }
 0x176   : > { %v485_v28 = vadd.f32 %v476_v25, %v453_v23  ;;  %v456_v29 = vadd.f32 %v714_v17, %v702_v27  ;;  %v382_v30 = vpop.f32.mrb[3].mxu1 }
 0x177   : > { %v483_v32 = vadd.f32 %v466_v21, %v445_v26  ;;  %v448_v33 = vadd.f32 %v447_v18, %v382_v30 }
 0x178   : > { %v486_v34 = vadd.f32 %v481_v31, %v456_v29  ;;  %v489_v36 = vmax.f32 %v485_v28, 0.0 }
 0x179   : > { %v484_v35 = vadd.f32 %v471_v20, %v448_v33  ;;  %v487_v38 = vmax.f32 %v483_v32, 0.0 }
 0x17a   : > { %v490_v37 = vmax.f32 %v486_v34, 0.0 }
 0x17b   : > { %v488_v39 = vmax.f32 %v484_v35, 0.0 }
 0x17c   : > { %v496_v40 = vpack.c.bf16 %v490_v37, %v489_v36 }
 0x17d   : > { %v495_v41 = vpack.c.bf16 %v488_v39, %v487_v38 }
 0x17f   : > { %715 = vmatprep.subr.bf16.mxu1 %v495_v41 }
 0x180   : > { %716 = vmatpush3.bf16.msra.mxu1 %v495_v41 }
 0x181   : > { %717 = vmatprep.subr.bf16.mxu1 %v496_v40 }
 0x184   : > { %718 = vmatpush3.bf16.msra.mxu1 %v496_v40 }
 0x187   : > { %720 = vmatmul.mubr.msk.bf16.vlgmr.msra.gmra.mrb[4].mxu1 %vm531_vm2, %v784_v42 }
 0x25a   : > { %v721_v46 = vpop.f32.mrb[4].mxu1 }
 0x25b   : > { %v581_v47 = vadd.f32 %v721_v46, %v514_v45  ;;  %v572_v48 = vpop.f32.mrb[5].mxu1 }
 0x25c   : > { %v573_v50 = vadd.f32 %v572_v48, %v504_v43  ;;  %v722_v51 = vpop.f32.mrb[6].mxu1 }
 0x25d   : > { %v589_v52 = vmax.f32 %v581_v47, 0.0  ;;  %v584_v53 = vadd.f32 %v722_v51, %v519_v49  ;;  %v575_v54 = vpop.f32.mrb[7].mxu1 }
 0x25e   : > { %v587_v55 = vmax.f32 %v573_v50, 0.0  ;;  %v576_v56 = vadd.f32 %v575_v54, %v509_v44 }
 0x25f   : > { %593 = vst [vmem:[%s251_s13 + $0x10] sm:$0xff] %v589_v52  ;;  %v590_v57 = vmax.f32 %v584_v53, 0.0 }
 0x260   : > { %591 = vst [vmem:[%s251_s13] sm:$0xff] %v587_v55  ;;  %v588_v58 = vmax.f32 %v576_v56, 0.0 }
 0x261   : > { %594 = vst [vmem:[%s251_s13 + $0x18] sm:$0xff] %v590_v57 }
 0x262   : > { %592 = vst [vmem:[%s251_s13 + $0x8] sm:$0xff] %v588_v58 }
 0x263 PF: > { %s16_s21 = sadd.s32 1, %s791_s21  }
 0x264   : > { %p13_p4 = scmp.ge.s32.totalorder %s16_s21, 4  }
 0x266   :  { %15 = sbr.rel (!%p13_p4) target bundleno = 1 (0x1), region = 74 }

// kernel: unet2_forward.11
= control target key start
LH: loop header
LB: loop body
LE: loop exit
PB: predicated region body
PF: predicated region fallthrough
CT: control target
= control target key end

     0   :  { %v477_v0 = vmov 0.0   ;;  %v479_v1 = vmov 0.0   ;;  %s481_s18 = smov 0   ;;  %s620_s0 = inlined_call_operand.vmem [shape: f32[15,2,512], index: 0, kind: input, shape index: {}]   ;;  %s621_s1 = inlined_call_operand.vmem [shape: f32[15,2,512], index: 1, kind: input, shape index: {}]   ;;  %s622_s2 = inlined_call_operand.vmem [shape: f32[64,512], index: 2, kind: input, shape index: {}]   ;;  %s623_s3 = inlined_call_operand.vmem [shape: f32[1,512], index: 3, kind: input, shape index: {}]   ;;  %s624_s4 = inlined_call_operand.vmem [shape: f32[15,2,64], index: 4, kind: output, shape index: {0}]   ;;  %s625_s5 = inlined_call_operand.vmem [shape: f32[15,2,64], index: 5, kind: output, shape index: {1}]  }
   0x1 LB: > { %v38_v2 = vld [vmem:[%s622_s2 + $0x8] sm:$0xff]  ;;  %v40_v4 = vld [vmem:[%s622_s2 + $0x18] sm:$0xff]  ;;  %v37_v7 = vld [vmem:[%s622_s2] sm:$0xff]  ;;  %v445_v9 = vmov 0.0   ;;  %vm69_vm0 = vcmask 523264   ;;  %v224_v51 = vlaneseq  ;;  %s27_s12 = ssub.s32 14, %s443_s18  ;;  %s443_s18 = sphi %s481_s18, %s24_s18   ;;  %v439_v1 = vphi %v479_v1, %v302_v1   ;;  %v435_v0 = vphi %v477_v0, %v300_v0  }
   0x2   : > { %v42_v3 = vld [vmem:[%s622_s2 + $0x28] sm:$0xff]  ;;  %v44_v6 = vld [vmem:[%s622_s2 + $0x38] sm:$0xff]  ;;  %v41_v8 = vld [vmem:[%s622_s2 + $0x20] sm:$0xff]  ;;  %137 = vmatprep.mubr.f32.mxu0 %v445_v9  ;;  %208 = vmatprep.mubr.f32.mxu1 %v445_v9  ;;  %v446_v57 = vmov 1983009808   ;;  %s345_s13 = sshll.u32 %s443_s18, 3 }
   0x3   : > { %v347_v5 = vpack.c.bf16 %v42_v3, %v38_v2  ;;  %v363_v10 = vpack.c.bf16 %v44_v6, %v40_v4  ;;  %v349_v11 = vpack.c.bf16 %v41_v8, %v37_v7  ;;  %v39_v12 = vld [vmem:[%s622_s2 + $0x10] sm:$0xff]  ;;  %v46_v14 = vld [vmem:[%s622_s2 + $0x48] sm:$0xff]  ;;  %v48_v17 = vld [vmem:[%s622_s2 + $0x58] sm:$0xff]  ;;  %v225_v52 = vshrl.u32 %v224_v51, 7  ;;  %s346_s14 = sshll.u32 %s27_s12, 3  ;;  %s30_s17 = scalar_lea.vmem %s620_s0, %s345_s13 }
   0x4   : > { %v43_v13 = vld [vmem:[%s622_s2 + $0x30] sm:$0xff]  ;;  %v50_v16 = vld [vmem:[%s622_s2 + $0x68] sm:$0xff]  ;;  %v52_v18 = vld [vmem:[%s622_s2 + $0x78] sm:$0xff]  ;;  %v222_v58 = vunpack.c.l.s4 %v446_v57  ;;  %s34_s21 = scalar_lea.vmem %s621_s1, %s346_s14  ;;  %s343_s22 = sshll.u32 %s443_s18, 1  ;;  %vm305_vm1 = vcmask 517120  }
   0x5   : > { %348 = vmatprep.subr.bf16.mxu0 %v347_v5  ;;  %v365_v15 = vpack.c.bf16 %v43_v13, %v39_v12  ;;  %364 = vmatprep.subr.bf16.mxu1 %v363_v10  ;;  %v351_v19 = vpack.c.bf16 %v50_v16, %v46_v14  ;;  %v367_v20 = vpack.c.bf16 %v52_v18, %v48_v17  ;;  %v45_v21 = vld [vmem:[%s622_s2 + $0x40] sm:$0xff]  ;;  %v47_v23 = vld [vmem:[%s622_s2 + $0x50] sm:$0xff]  ;;  %v54_v26 = vld [vmem:[%s622_s2 + $0x88] sm:$0xff]  ;;  %v242_v53 = vsub.s32 0, %v225_v52  ;;  %s344_s23 = sshll.u32 %s27_s12, 1  ;;  %s304_s26 = scalar_lea.vmem %s624_s4, %s343_s22 }
   0x6   : > { %350 = vmatpush1.bf16.msra.mxu0 %v349_v11  ;;  %v49_v22 = vld [vmem:[%s622_s2 + $0x60] sm:$0xff]  ;;  %v51_v25 = vld [vmem:[%s622_s2 + $0x70] sm:$0xff]  ;;  %v58_v27 = vld [vmem:[%s622_s2 + $0xa8] sm:$0xff]  ;;  %v246_v54 = vsub.s32 1, %v225_v52  ;;  %v250_v55 = vsub.s32 2, %v225_v52  ;;  %v254_v56 = vsub.s32 3, %v225_v52  ;;  %s308_s29 = scalar_lea.vmem %s625_s5, %s344_s23 }
   0x7   : > { %366 = vmatpush1.bf16.msra.mxu1 %v365_v15  ;;  %v353_v24 = vpack.c.bf16 %v49_v22, %v45_v21  ;;  %352 = vmatprep.subr.bf16.mxu0 %v351_v19  ;;  %v369_v28 = vpack.c.bf16 %v51_v25, %v47_v23  ;;  %v355_v29 = vpack.c.bf16 %v58_v27, %v54_v26  ;;  %v56_v30 = vld [vmem:[%s622_s2 + $0x98] sm:$0xff]  ;;  %v53_v32 = vld [vmem:[%s622_s2 + $0x80] sm:$0xff]  ;;  %v55_v35 = vld [vmem:[%s622_s2 + $0x90] sm:$0xff]  ;;  %s24_s18 = sadd.s32 1, %s443_s18  }
   0x8   : > { %368 = vmatprep.subr.bf16.mxu1 %v367_v20  ;;  %v60_v31 = vld [vmem:[%s622_s2 + $0xb8] sm:$0xff]  ;;  %v57_v34 = vld [vmem:[%s622_s2 + $0xa0] sm:$0xff]  ;;  %v59_v36 = vld [vmem:[%s622_s2 + $0xb0] sm:$0xff]  ;;  %p21_p0 = scmp.ge.s32.totalorder %s24_s18, 15  }
   0x9   : > { %v371_v33 = vpack.c.bf16 %v60_v31, %v56_v30  ;;  %v357_v37 = vpack.c.bf16 %v57_v34, %v53_v32  ;;  %v62_v38 = vld [vmem:[%s622_s2 + $0xc8] sm:$0xff]  ;;  %v64_v40 = vld [vmem:[%s622_s2 + $0xd8] sm:$0xff]  ;;  %v373_v41 = vpack.c.bf16 %v59_v36, %v55_v35  ;;  %v61_v44 = vld [vmem:[%s622_s2 + $0xc0] sm:$0xff] }
   0xa   : > { %354 = vmatpush1.bf16.msra.mxu0 %v353_v24  ;;  %v66_v39 = vld [vmem:[%s622_s2 + $0xe8] sm:$0xff]  ;;  %v68_v43 = vld [vmem:[%s622_s2 + $0xf8] sm:$0xff]  ;;  %v65_v45 = vld [vmem:[%s622_s2 + $0xe0] sm:$0xff] }
   0xb   : > { %370 = vmatpush1.bf16.msra.mxu1 %v369_v28  ;;  %356 = vmatprep.subr.bf16.mxu0 %v355_v29  ;;  %v359_v42 = vpack.c.bf16 %v66_v39, %v62_v38  ;;  %v375_v46 = vpack.c.bf16 %v68_v43, %v64_v40  ;;  %v63_v47 = vld [vmem:[%s622_s2 + $0xd0] sm:$0xff]  ;;  %v361_v49 = vpack.c.bf16 %v65_v45, %v61_v44  ;;  %v238_v59 = vld [vmem:[%s623_s3] sm:$0xf] }
   0xc   : > { %372 = vmatprep.subr.bf16.mxu1 %v371_v33  ;;  %v67_v48 = vld [vmem:[%s622_s2 + $0xf0] sm:$0xff]  ;;  %v243_v60 = vrot.slane %v238_v59, %v242_v53  ;;  %v247_v61 = vrot.slane %v238_v59, %v246_v54  ;;  %v251_v62 = vrot.slane %v238_v59, %v250_v55  ;;  %v255_v63 = vrot.slane %v238_v59, %v254_v56  ;;  %v31_v9 = vld [vmem:[%s30_s17] sm:$0xff] }
   0xd   : > { %v377_v50 = vpack.c.bf16 %v67_v48, %v63_v47  ;;  %v35_v10 = vld [vmem:[%s34_s21] sm:$0xff] }
   0xe   : > { %358 = vmatpush1.bf16.msra.mxu0 %v357_v37  ;;  %v256_v2 = vcombine.low %v243_v60, %v247_v61  ;;  %v257_v3 = vcombine.low %v251_v62, %v255_v63  ;;  %v36_v16 = vadd.f32 %v35_v10, %v31_v9 }
   0xf   : > { %374 = vmatpush1.bf16.msra.mxu1 %v373_v41  ;;  %360 = vmatprep.subr.bf16.mxu0 %v359_v42 }
  0x10   : > { %376 = vmatprep.subr.bf16.mxu1 %v375_v46 }
  0x12   : > { %362 = vmatpush1.bf16.msra.mxu0 %v361_v49 }
  0x13   : > { %378 = vmatpush1.bf16.msra.mxu1 %v377_v50 }
  0x15   : > { %341 = vmatmul.mubr.msk.f32.vlgmr.msra.gmra.mrb[0].mxu0 %vm69_vm0, %v439_v1 }
  0x16   : > { %342 = vmatmul.mubr.msk.f32.vlgmr.msra.gmra.mrb[0].mxu1 %vm69_vm0, %v439_v1  ;;  %v223_v1 = vunpack.c.0.s8 %v222_v58 }
  0x18   : > { %v226_v5 = vsub.s32 %v223_v1, %v225_v52 }
  0x1a   : > { %v264_v13 = vrot.slane %v256_v2, %v226_v5  ;;  %v271_v14 = vrot.slane %v257_v3, %v226_v5 }
  0x1c   : > { %v272_v19 = vcombine.low %v264_v13, %v271_v14 }
  0xe8   : > { %v139_v4 = vpop.f32.mrb[0].mxu0 }
  0xe9   : > { %v210_v6 = vpop.f32.mrb[0].mxu1  ;;  %v141_v7 = vpop.f32.mrb[1].mxu0 }
  0xea   : > { %v219_v8 = vcombine.low %v139_v4, %v141_v7  ;;  %v212_v11 = vpop.f32.mrb[1].mxu1 }
  0xeb   : > { %v220_v12 = vcombine.low %v210_v6, %v212_v11 }
  0xec   : > { %v227_v15 = vrot.slane %v219_v8, %v226_v5 }
  0xed   : > { %v234_v17 = vrot.slane %v220_v12, %v226_v5 }
  0xef   : > { %v235_v18 = vcombine.low %v227_v15, %v234_v17 }
  0xf1   : > { %v237_v20 = vadd.f32 %v235_v18, %v36_v16 }
  0xf3   : > { %v274_v21 = vadd.f32 %v272_v19, %v237_v20 }
  0xf5   : > { %v275_v22 = vsub.f32 0.0, %v274_v21  ;;  %v281_v23 = vrot.slane %v274_v21, 2  ;;  %v291_v27 = vrot.slane %v274_v21, 6  ;;  %v288_v31 = vrot.slane %v274_v21, 4 }
  0xf7   : > { %v276_v24 = vmul.f32 1.442695, %v275_v22  ;;  %v283_v25 = vsub.f32 0.0, %v281_v23  ;;  %v293_v28 = vsub.f32 0.0, %v291_v27 }
  0xf9   : > { %405 = vpow2.f32 %v276_v24  ;;  %v284_v26 = vmul.f32 1.442695, %v283_v25  ;;  %v294_v29 = vmul.f32 1.442695, %v293_v28 }
  0xfb   : > { %407 = vpow2.f32 %v284_v26 }
  0xfc   : > { %409 = vpow2.f32 %v294_v29 }
 0x103   : > { %v406_v30 = vpop.eup %405 }
 0x104   : > { %v278_v32 = vadd.f32 1.0, %v406_v30 }
 0x105   : > { %v408_v33 = vpop.eup %407 }
 0x106   : > { %411 = vrcp.f32 %v278_v32  ;;  %v286_v34 = vadd.f32 1.0, %v408_v33  ;;  %v410_v35 = vpop.eup %409 }
 0x107   : > { %413 = vtanh.f32 %v288_v31  ;;  %v296_v39 = vadd.f32 1.0, %v410_v35 }
 0x108   : > { %415 = vrcp.f32 %v286_v34 }
 0x109   : > { %417 = vrcp.f32 %v296_v39 }
 0x110   : > { %v412_v36 = vpop.eup %411 }
 0x111   : > { %v414_v37 = vpop.eup %413 }
 0x112   : > { %v416_v38 = vpop.eup %415  ;;  %v299_v41 = vmul.f32 %v414_v37, %v412_v36 }
 0x113   : > { %v298_v40 = vmul.f32 %v435_v0, %v416_v38  ;;  %v418_v42 = vpop.eup %417 }
 0x115   : > { %v300_v0 = vadd.f32 %v299_v41, %v298_v40  }
 0x117   : > { %419 = vtanh.f32 %v300_v0 }
 0x11e   :  { %23 = sbr.rel (!%p21_p0) target bundleno = 1 (0x1), region = 55 }
 0x121   : > { %v420_v43 = vpop.eup %419 }
 0x122   : > { %v302_v1 = vmul.f32 %v420_v43, %v418_v42  }
 0x124   : > { %306 = vst.msk [vmem:[%s304_s26] sm:$0x3] %vm305_vm1, %v302_v1  ;;  %309 = vst.msk [vmem:[%s308_s29] sm:$0x3] %vm305_vm1, %v302_v1 }

// kernel: unet2_forward.13
= control target key start
LH: loop header
LB: loop body
LE: loop exit
PB: predicated region body
PF: predicated region fallthrough
CT: control target
= control target key end

     0   :  { %s954_s24 = smov 0   ;;  %s1064_s0 = inlined_call_operand.vmem [shape: f32[2,32,128], index: 0, kind: input, shape index: {}]   ;;  %s1065_s1 = inlined_call_operand.vmem [shape: f32[2,32,128], index: 1, kind: input, shape index: {}]   ;;  %s1066_s2 = inlined_call_operand.vmem [shape: bf16[32,32], index: 2, kind: input, shape index: {}]   ;;  %s1067_s3 = inlined_call_operand.vmem [shape: f32[32,1], index: 3, kind: input, shape index: {}]   ;;  %s1068_s4 = inlined_call_operand.vmem [shape: bf16[64,32], index: 4, kind: input, shape index: {}]   ;;  %s1069_s5 = inlined_call_operand.vmem [shape: bf16[64,32], index: 5, kind: input, shape index: {}]   ;;  %s1070_s6 = inlined_call_operand.vmem [shape: f32[64,1], index: 6, kind: input, shape index: {}]   ;;  %s1071_s7 = inlined_call_operand.vmem [shape: f32[2,64,128], index: 7, kind: output, shape index: {}]  }
   0x1 LB: > { %s786_s25 = sadd.s32 4294967295, %s910_s24   ;;  %p790_p0 = scmp.ge.s32.totalorder %s910_s24, 1  ;;  %s910_s24 = sphi %s954_s24, %s17_s24  }
   0x2   : > { %p247_p1 = scmp.lt.s32.totalorder %s910_s24, 3 }
   0x4   : > { %p248_p2 = pnand %p790_p0, %p247_p1 }
   0x5   : > { %p284_p3 = scmp.lt.s32.totalorder (!%p248_p2), %s786_s25, 1  ;;  %v894_v0 = vld [vmem:[%s1066_s2] sm:$0xff] (!%p248_p2)   ;;  %vm352_vm0 = vcmask (!%p248_p2), 261120   ;;  %v320_v2 = vld [vmem:[%s1067_s3 + $0x10] sm:$0xff] (!%p248_p2)  ;;  %v912_v3 = vmov (!%p248_p2), 0   ;;  %v319_v4 = vld [vmem:[%s1067_s3 + $0x8] sm:$0xff] (!%p248_p2)  ;;  %v412_v32 = vlaneseq (!%p248_p2) }
   0x6   : > { %251 = sbr.rel (%p248_p2) target bundleno = 608 (0x260), region = 48  ;;  %854 = vmatprep.mubr.msk.bf16.mxu0 (!%p248_p2), %vm352_vm0, %v894_v0  ;;  %v318_v1 = vld [vmem:[%s1067_s3] sm:$0xff] (!%p248_p2)  ;;  %892 = vset.pattern.permute.xlu0 (!%p248_p2), %v912_v3  ;;  %v321_v5 = vld [vmem:[%s1067_s3 + $0x18] sm:$0xff] (!%p248_p2)  ;;  %v648_v17 = vld [vmem:[%s1070_s6 + $0x8] sm:$0xff] (!%p248_p2) }
   0x7   : > { %893 = vset.pattern.permute.xlu1 (!%p248_p2), %v912_v3  ;;  %324 = vperm.xlu0 (!%p248_p2), %892, %v318_v1   ;;  %v647_v13 = vld [vmem:[%s1070_s6] sm:$0xff] (!%p248_p2)  ;;  %v649_v22 = vld [vmem:[%s1070_s6 + $0x10] sm:$0xff] (!%p248_p2)  ;;  %v650_v23 = vld [vmem:[%s1070_s6 + $0x18] sm:$0xff] (!%p248_p2)  ;;  %v413_v35 = vand.u32 (!%p248_p2), 127, %v412_v32 }
   0x8   : > { %334 = vperm.xlu1 (!%p248_p2), %893, %v320_v2   ;;  %v895_v24 = vld [vmem:[%s1066_s2 + $0x8] sm:$0xff] (!%p248_p2)   ;;  %v651_v25 = vld [vmem:[%s1070_s6 + $0x20] sm:$0xff] (!%p248_p2)  ;;  %v653_v27 = vld [vmem:[%s1070_s6 + $0x30] sm:$0xff] (!%p248_p2) }
   0x9   : > { %v652_v26 = vld [vmem:[%s1070_s6 + $0x28] sm:$0xff] (!%p248_p2)  ;;  %v654_v28 = vld [vmem:[%s1070_s6 + $0x38] sm:$0xff] (!%p248_p2)  ;;  %v896_v29 = vld [vmem:[%s1069_s5] sm:$0xff] (!%p248_p2)   ;;  %vm414_vm1 = vcmp.lt.s32.totalorder (!%p248_p2), %v413_v35, 15 }
   0xa   : > { %862 = vmatprep.mubr.msk.bf16.mxu1 (!%p248_p2), %vm352_vm0, %v896_v29  ;;  %v900_v30 = vld [vmem:[%s1068_s4] sm:$0xff] (!%p248_p2)   ;;  %vm805_vm2 = vmpackc.low (!%p248_p2), %vm414_vm1, %vm414_vm1  ;;  %v897_v51 = vld [vmem:[%s1069_s5 + $0x8] sm:$0xff] (!%p248_p2)  }
   0xb   : > { %329 = vperm.xlu0 (!%p248_p2), %892, %v319_v4   ;;  %v901_v52 = vld [vmem:[%s1068_s4 + $0x8] sm:$0xff] (!%p248_p2)   ;;  %v898_v53 = vld [vmem:[%s1069_s5 + $0x10] sm:$0xff] (!%p248_p2)   ;;  %v899_v55 = vld [vmem:[%s1069_s5 + $0x18] sm:$0xff] (!%p248_p2)  }
   0xc   : > { %339 = vperm.xlu1 (!%p248_p2), %893, %v321_v5   ;;  %v902_v54 = vld [vmem:[%s1068_s4 + $0x10] sm:$0xff] (!%p248_p2)   ;;  %v903_v56 = vld [vmem:[%s1068_s4 + $0x18] sm:$0xff] (!%p248_p2)  }
   0xd   : > { %s1073_s25 = smov (!%p284_p3, %s786_s25), 1 }
   0xe   : > { %s831_s9 = sshll.u32 %s1073_s25, 5  ;;  %s833_s13 = sshll.u32 %s1073_s25, 6 }
   0xf   : > { %s288_s12 = scalar_lea.vmem %s1064_s0, %s831_s9  ;;  %s293_s15 = scalar_lea.vmem %s1065_s1, %s831_s9  ;;  %657 = vperm.xlu0 %892, %v647_v13  }
  0x10   : > { %v300_v6 = vld [vmem:[%s288_s12] sm:$0xff]  ;;  %v301_v7 = vld [vmem:[%s288_s12 + $0x8] sm:$0xff]  ;;  %v302_v11 = vld [vmem:[%s288_s12 + $0x10] sm:$0xff]  ;;  %662 = vperm.xlu1 %893, %v648_v17   ;;  %s1051_s16 = scalar_lea.vmem %s1071_s7, %s833_s13 }
  0x11   : > { %v304_v8 = vld [vmem:[%s293_s15] sm:$0xff]  ;;  %v305_v9 = vld [vmem:[%s293_s15 + $0x8] sm:$0xff]  ;;  %v303_v12 = vld [vmem:[%s288_s12 + $0x18] sm:$0xff]  ;;  %s913_s12 = smov 1  }
  0x12   : > { %v308_v10 = vadd.f32 %v304_v8, %v300_v6  ;;  %v309_v14 = vadd.f32 %v305_v9, %v301_v7  ;;  %v306_v15 = vld [vmem:[%s293_s15 + $0x10] sm:$0xff]  ;;  %v307_v16 = vld [vmem:[%s293_s15 + $0x18] sm:$0xff] }
  0x13   : > { %v310_v18 = vadd.f32 %v306_v15, %v302_v11  ;;  %v311_v19 = vadd.f32 %v307_v16, %v303_v12  ;;  %667 = vperm.xlu0 %892, %v649_v22  }
  0x14   : > { %v316_v20 = vpack.c.bf16 %v309_v14, %v308_v10  ;;  %672 = vperm.xlu1 %893, %v650_v23  }
  0x15   : > { %v317_v21 = vpack.c.bf16 %v311_v19, %v310_v18 }
  0x16   : > { %850 = vmatprep.subr.bf16.mxu0 %v316_v20 }
  0x17   : > { %851 = vmatpush3.bf16.msra.mxu0 %v316_v20  ;;  %677 = vperm.xlu0 %892, %v651_v25  }
  0x18   : > { %852 = vmatprep.subr.bf16.mxu0 %v317_v21  ;;  %682 = vperm.xlu1 %893, %v652_v26  }
  0x1b   : > { %853 = vmatpush3.bf16.msra.mxu0 %v317_v21  ;;  %687 = vperm.xlu0 %892, %v653_v27  }
  0x1c   : > { %692 = vperm.xlu1 %893, %v654_v28  }
  0x1e   : > { %855 = vmatmul.mubr.msk.bf16.vlgmr.msra.gmra.mrb[0].mxu0 %vm352_vm0, %v895_v24 }
  0x1f   : > { %874 = vmatprep.mubr.msk.bf16.mxu0 %vm352_vm0, %v900_v30 }
  0x86   : > { %v325_v33 = vpop.permute.xlu0 %324 }
  0x87   : > { %v335_v31 = vpop.permute.xlu1 %334 }
  0x8a   : > { %v330_v41 = vpop.permute.xlu0 %329 }
  0x8b   : > { %v340_v38 = vpop.permute.xlu1 %339 }
  0x8e   : > { %v658_v9 = vpop.permute.xlu0 %657 }
  0x8f   : > { %v663_v10 = vpop.permute.xlu1 %662 }
  0x92   : > { %v668_v11 = vpop.permute.xlu0 %667 }
  0x93   : > { %v673_v12 = vpop.permute.xlu1 %672 }
  0x96   : > { %v678_v13 = vpop.permute.xlu0 %677 }
  0x97   : > { %v683_v14 = vpop.permute.xlu1 %682 }
  0x9a   : > { %v688_v15 = vpop.permute.xlu0 %687 }
  0x9b   : > { %v693_v16 = vpop.permute.xlu1 %692 }
  0xf1   : > { %v856_v34 = vpop.f32.mrb[0].mxu0 }
  0xf2   : > { %v402_v36 = vadd.f32 %v856_v34, %v335_v31  ;;  %v393_v37 = vpop.f32.mrb[1].mxu0 }
  0xf3   : > { %v394_v39 = vadd.f32 %v393_v37, %v325_v33  ;;  %v857_v40 = vpop.f32.mrb[2].mxu0 }
  0xf4   : > { %v405_v42 = vadd.f32 %v857_v40, %v340_v38  ;;  %v396_v43 = vpop.f32.mrb[3].mxu0  ;;  %v410_v45 = vmax.f32 %v402_v36, 0.0 }
  0xf5   : > { %v397_v44 = vadd.f32 %v396_v43, %v330_v41  ;;  %v408_v47 = vmax.f32 %v394_v39, 0.0 }
  0xf6   : > { %v411_v46 = vmax.f32 %v405_v42, 0.0 }
  0xf7   : > { %v409_v48 = vmax.f32 %v397_v44, 0.0 }
  0xf8   : > { %v809_v49 = vpack.c.bf16 %v411_v46, %v410_v45 }
  0xf9   : > { %v806_v50 = vpack.c.bf16 %v409_v48, %v408_v47 }
  0xfb   : > { %858 = vmatprep.subr.msk.bf16.mxu1 %vm805_vm2, %v806_v50  ;;  %870 = vmatprep.subr.msk.bf16.mxu0 %vm805_vm2, %v806_v50 }
  0xfc   : > { %859 = vmatpush3.bf16.msk.msra.mxu1 %vm805_vm2, %v806_v50  ;;  %871 = vmatpush3.bf16.msk.msra.mxu0 %vm805_vm2, %v806_v50 }
  0xfd   : > { %860 = vmatprep.subr.msk.bf16.mxu1 %vm805_vm2, %v809_v49  ;;  %872 = vmatprep.subr.msk.bf16.mxu0 %vm805_vm2, %v809_v49 }
 0x100   : > { %861 = vmatpush3.bf16.msk.msra.mxu1 %vm805_vm2, %v809_v49  ;;  %873 = vmatpush3.bf16.msk.msra.mxu0 %vm805_vm2, %v809_v49 }
 0x103   : > { %863 = vmatmul.mubr.msk.bf16.vlgmr.msra.gmra.mrb[0].mxu1 %vm352_vm0, %v897_v51  ;;  %875 = vmatmul.mubr.msk.bf16.vlgmr.msra.gmra.mrb[4].mxu0 %vm352_vm0, %v901_v52 }
 0x104   : > { %866 = vmatprep.mubr.msk.bf16.mxu1 %vm352_vm0, %v898_v53  ;;  %878 = vmatprep.mubr.msk.bf16.mxu0 %vm352_vm0, %v902_v54 }
 0x10b   : > { %867 = vmatmul.mubr.msk.bf16.gmra.mrb[4].mxu1 %vm352_vm0, %v899_v55  ;;  %879 = vmatmul.mubr.msk.bf16.gmra.mrb[8].mxu0 %vm352_vm0, %v903_v56 }
 0x1d6   : > { %v864_v57 = vpop.f32.mrb[0].mxu1  ;;  %v876_v58 = vpop.f32.mrb[4].mxu0 }
 0x1d7   : > { %538 = vrot.lane.b32.xlu0 %v864_v57, %s913_s12  ;;  %v503_v59 = vpop.f32.mrb[1].mxu1  ;;  %v616_v60 = vpop.f32.mrb[5].mxu0 }
 0x1d8   : > { %v865_v61 = vpop.f32.mrb[2].mxu1  ;;  %v877_v62 = vpop.f32.mrb[6].mxu0 }
 0x1d9   : > { %540 = vrot.lane.b32.xlu1 %v865_v61, %s913_s12  ;;  %v506_v63 = vpop.f32.mrb[3].mxu1  ;;  %v619_v0 = vpop.f32.mrb[7].mxu0 }
 0x1db   : > { %534 = vrot.lane.b32.xlu0 %v503_v59, %s913_s12 }
 0x1dd   : > { %536 = vrot.lane.b32.xlu1 %v506_v63, %s913_s12 }
 0x1de   : > { %v868_v1 = vpop.f32.mrb[4].mxu1  ;;  %v880_v2 = vpop.f32.mrb[8].mxu0 }
 0x1df   : > { %v519_v3 = vpop.f32.mrb[5].mxu1  ;;  %v632_v4 = vpop.f32.mrb[9].mxu0 }
 0x1e0   : > { %542 = vrot.lane.b32.xlu0 %v519_v3, %s913_s12  ;;  %v869_v5 = vpop.f32.mrb[6].mxu1  ;;  %v881_v6 = vpop.f32.mrb[10].mxu0 }
 0x1e1   : > { %v522_v7 = vpop.f32.mrb[7].mxu1  ;;  %v635_v8 = vpop.f32.mrb[11].mxu0 }
 0x1e2   : > { %544 = vrot.lane.b32.xlu1 %v522_v7, %s913_s12 }
 0x1e4   : > { %546 = vrot.lane.b32.xlu0 %v868_v1, %s913_s12 }
 0x1e6   : > { %548 = vrot.lane.b32.xlu1 %v869_v5, %s913_s12 }
 0x249   : > { %v539_v17 = vpop.permute.xlu0 %538 }
 0x24a   : > { %v625_v18 = vadd.f32 %v876_v58, %v539_v17 }
 0x24b   : > { %v541_v19 = vpop.permute.xlu1 %540 }
 0x24c   : > { %v697_v20 = vadd.f32 %v668_v11, %v625_v18  ;;  %v628_v21 = vadd.f32 %v877_v62, %v541_v19 }
 0x24d   : > { %v535_v22 = vpop.permute.xlu0 %534 }
 0x24e   : > { %v705_v23 = vmax.f32 %v697_v20, 0.0  ;;  %v698_v24 = vadd.f32 %v673_v12, %v628_v21  ;;  %v617_v25 = vadd.f32 %v616_v60, %v535_v22 }
 0x24f   : > { %v537_v26 = vpop.permute.xlu1 %536 }
 0x250   : > { %713 = vst [vmem:[%s1051_s16 + $0x10] sm:$0xff] %v705_v23  ;;  %v706_v27 = vmax.f32 %v698_v24, 0.0  ;;  %v695_v28 = vadd.f32 %v658_v9, %v617_v25  ;;  %v620_v29 = vadd.f32 %v619_v0, %v537_v26 }
 0x252   : > { %714 = vst [vmem:[%s1051_s16 + $0x18] sm:$0xff] %v706_v27  ;;  %v703_v30 = vmax.f32 %v695_v28, 0.0  ;;  %v696_v31 = vadd.f32 %v663_v10, %v620_v29  ;;  %v543_v32 = vpop.permute.xlu0 %542 }
 0x253   : > { %v633_v33 = vadd.f32 %v632_v4, %v543_v32 }
 0x254   : > { %711 = vst [vmem:[%s1051_s16] sm:$0xff] %v703_v30  ;;  %v704_v34 = vmax.f32 %v696_v31, 0.0  ;;  %v545_v35 = vpop.permute.xlu1 %544 }
 0x255   : > { %v699_v36 = vadd.f32 %v678_v13, %v633_v33  ;;  %v636_v37 = vadd.f32 %v635_v8, %v545_v35 }
 0x256   : > { %712 = vst [vmem:[%s1051_s16 + $0x8] sm:$0xff] %v704_v34  ;;  %v547_v38 = vpop.permute.xlu0 %546 }
 0x257   : > { %v707_v39 = vmax.f32 %v699_v36, 0.0  ;;  %v700_v40 = vadd.f32 %v683_v14, %v636_v37  ;;  %v641_v41 = vadd.f32 %v880_v2, %v547_v38 }
 0x258   : > { %v549_v42 = vpop.permute.xlu1 %548 }
 0x259   : > { %715 = vst [vmem:[%s1051_s16 + $0x20] sm:$0xff] %v707_v39  ;;  %v708_v43 = vmax.f32 %v700_v40, 0.0  ;;  %v701_v44 = vadd.f32 %v688_v15, %v641_v41  ;;  %v644_v45 = vadd.f32 %v881_v6, %v549_v42 }
 0x25b   : > { %716 = vst [vmem:[%s1051_s16 + $0x28] sm:$0xff] %v708_v43  ;;  %v709_v46 = vmax.f32 %v701_v44, 0.0  ;;  %v702_v47 = vadd.f32 %v693_v16, %v644_v45 }
 0x25d   : > { %717 = vst [vmem:[%s1051_s16 + $0x30] sm:$0xff] %v709_v46  ;;  %v710_v48 = vmax.f32 %v702_v47, 0.0 }
 0x25f   : > { %718 = vst [vmem:[%s1051_s16 + $0x38] sm:$0xff] %v710_v48 }
 0x260 PF: > { %s17_s24 = sadd.s32 1, %s910_s24  }
 0x261   : > { %p14_p4 = scmp.ge.s32.totalorder %s17_s24, 4  }
 0x263   :  { %16 = sbr.rel (!%p14_p4) target bundleno = 1 (0x1), region = 81 }

// kernel: unet2_forward.14
= control target key start
LH: loop header
LB: loop body
LE: loop exit
PB: predicated region body
PF: predicated region fallthrough
CT: control target
= control target key end

     0   :  { %s655_s24 = smov 0   ;;  %s703_s0 = inlined_call_operand.vmem [shape: f32[2,16,128], index: 0, kind: input, shape index: {}]   ;;  %s704_s1 = inlined_call_operand.vmem [shape: f32[2,16,128], index: 1, kind: input, shape index: {}]   ;;  %s705_s2 = inlined_call_operand.vmem [shape: bf16[16,16], index: 2, kind: input, shape index: {}]   ;;  %s706_s3 = inlined_call_operand.vmem [shape: f32[16,1], index: 3, kind: input, shape index: {}]   ;;  %s707_s4 = inlined_call_operand.vmem [shape: bf16[4,16], index: 4, kind: input, shape index: {}]   ;;  %s708_s5 = inlined_call_operand.vmem [shape: bf16[4,16], index: 5, kind: input, shape index: {}]   ;;  %s709_s6 = inlined_call_operand.vmem [shape: f32[4,1], index: 6, kind: input, shape index: {}]   ;;  %s710_s7 = inlined_call_operand.vmem [shape: f32[2,4,128], index: 7, kind: output, shape index: {}]  }
   0x1 LB: > { %s540_s25 = sadd.s32 4294967295, %s609_s24   ;;  %p544_p0 = scmp.ge.s32.totalorder %s609_s24, 1  ;;  %s609_s24 = sphi %s655_s24, %s17_s24  }
   0x2   : > { %p247_p1 = scmp.lt.s32.totalorder %s609_s24, 3 }
   0x4   : > { %p248_p2 = pnand %p544_p0, %p247_p1 }
   0x5   : > { %p283_p3 = scmp.lt.s32.totalorder (!%p248_p2), %s540_s25, 1  ;;  %v611_v0 = vmov (!%p248_p2), 0.0   ;;  %vm612_vm0 = vmmov (!%p248_p2), 0   ;;  %v307_v1 = vld [vmem:[%s706_s3] sm:$0xff] (!%p248_p2)  ;;  %v613_v2 = vmov (!%p248_p2), 0   ;;  %v308_v3 = vld [vmem:[%s706_s3 + $0x8] sm:$0xff] (!%p248_p2)  ;;  %v371_v13 = vlaneseq (!%p248_p2) }
   0x6   : > { %251 = sbr.rel (%p248_p2) target bundleno = 580 (0x244), region = 48  ;;  %570 = vmatprep.subr.bf16.mxu0 (!%p248_p2), %v611_v0  ;;  %572 = vmatprep.mubr.msk.bf16.mxu0 (!%p248_p2), %vm612_vm0, %v611_v0  ;;  %v602_v11 = vld [vmem:[%s705_s2] sm:$0xff] (!%p248_p2)   ;;  %vm324_vm1 = vcmask (!%p248_p2), 130048   ;;  %s614_s22 = smov (!%p248_p2), 1  }
   0x7   : > { %600 = vset.pattern.permute.xlu0 (!%p248_p2), %v613_v2  ;;  %576 = vmatprep.subr.bf16.mxu1 (!%p248_p2), %v611_v0  ;;  %v467_v12 = vld [vmem:[%s709_s6] sm:$0xf] (!%p248_p2)  ;;  %v372_v15 = vand.u32 (!%p248_p2), 127, %v371_v13 }
   0x8   : > { %311 = vperm.xlu0 (!%p248_p2), %600, %v307_v1   ;;  %578 = vmatprep.mubr.msk.bf16.mxu1 (!%p248_p2), %vm612_vm0, %v611_v0  ;;  %v378_v26 = vld [vmem:[%s708_s5] sm:$0x3] (!%p248_p2) }
   0x9   : > { %601 = vset.pattern.permute.xlu1 (!%p248_p2), %v613_v2  ;;  %vm373_vm2 = vcmp.lt.s32.totalorder (!%p248_p2), %v372_v15, 64  ;;  %v377_v27 = vld [vmem:[%s707_s4] sm:$0x3] (!%p248_p2) }
   0xa   : > { %470 = vperm.xlu1 (!%p248_p2), %601, %v467_v12   ;;  %vm552_vm3 = vmpackc.low (!%p248_p2), %vm373_vm2, %vm373_vm2 }
   0xc   : > { %316 = vperm.xlu0 (!%p248_p2), %600, %v308_v3  }
   0xd   : > { %s712_s25 = smov (!%p283_p3, %s540_s25), 1 }
   0xe   : > { %s562_s28 = sshll.u32 %s712_s25, 4  ;;  %s549_s23 = sshll.u32 %s712_s25, 2 }
   0xf   : > { %s287_s10 = scalar_lea.vmem %s703_s0, %s562_s28  ;;  %s292_s13 = scalar_lea.vmem %s704_s1, %s562_s28 }
  0x10   : > { %v298_v4 = vld [vmem:[%s287_s10] sm:$0xff]  ;;  %v299_v5 = vld [vmem:[%s287_s10 + $0x8] sm:$0xff]  ;;  %s296_s28 = scalar_lea.vmem %s710_s7, %s549_s23 }
  0x11   : > { %v300_v6 = vld [vmem:[%s292_s13] sm:$0xff]  ;;  %v301_v7 = vld [vmem:[%s292_s13 + $0x8] sm:$0xff] }
  0x12   : > { %v302_v8 = vadd.f32 %v300_v6, %v298_v4  ;;  %v303_v9 = vadd.f32 %v301_v7, %v299_v5 }
  0x14   : > { %v306_v10 = vpack.c.bf16 %v303_v9, %v302_v8 }
  0x16   : > { %571 = vmatpush3.bf16.msra.mxu0 %v306_v10 }
  0x17   : > { %582 = vmatprep.subr.bf16.mxu0 %v611_v0 }
  0x19   : > { %573 = vmatmul.mubr.msk.bf16.vlgmr.msra.gmra.mrb[0].mxu0 %vm324_vm1, %v602_v11 }
  0x1a   : > { %584 = vmatprep.mubr.msk.bf16.mxu0 %vm612_vm0, %v611_v0 }
  0x87   : > { %v312_v14 = vpop.permute.xlu0 %311 }
  0x89   : > { %v471_v36 = vpop.permute.xlu1 %470 }
  0x8b   : > { %v317_v19 = vpop.permute.xlu0 %316 }
  0xec   : > { %v362_v16 = vpop.f32.mrb[0].mxu0 }
  0xed   : > { %v363_v17 = vadd.f32 %v362_v16, %v312_v14  ;;  %v574_v18 = vpop.f32.mrb[1].mxu0 }
  0xee   : > { %v365_v20 = vpop.f32.mrb[2].mxu0 }
  0xef   : > { %v366_v21 = vadd.f32 %v365_v20, %v317_v19  ;;  %v575_v22 = vpop.f32.mrb[3].mxu0  ;;  %v369_v23 = vmax.f32 %v363_v17, 0.0 }
  0xf1   : > { %v370_v24 = vmax.f32 %v366_v21, 0.0 }
  0xf3   : > { %v553_v25 = vpack.c.bf16 %v370_v24, %v369_v23 }
  0xf5   : > { %577 = vmatpush3.bf16.msk.msra.mxu1 %vm552_vm3, %v553_v25  ;;  %583 = vmatpush3.bf16.msk.msra.mxu0 %vm552_vm3, %v553_v25 }
  0xf8   : > { %579 = vmatmul.mubr.msk.bf16.vlgmr.msra.gmra.mrb[0].mxu1 %vm324_vm1, %v378_v26  ;;  %585 = vmatmul.mubr.msk.bf16.vlgmr.msra.gmra.mrb[4].mxu0 %vm324_vm1, %v377_v27 }
 0x1cb   : > { %v416_v28 = vpop.f32.mrb[0].mxu1  ;;  %v461_v29 = vpop.f32.mrb[4].mxu0 }
 0x1cc   : > { %422 = vrot.lane.b32.xlu1 %v416_v28, %s614_s22  ;;  %v580_v30 = vpop.f32.mrb[1].mxu1  ;;  %v586_v31 = vpop.f32.mrb[5].mxu0 }
 0x1cd   : > { %v419_v32 = vpop.f32.mrb[2].mxu1  ;;  %v464_v33 = vpop.f32.mrb[6].mxu0 }
 0x1ce   : > { %v581_v34 = vpop.f32.mrb[3].mxu1  ;;  %v587_v35 = vpop.f32.mrb[7].mxu0 }
 0x23e   : > { %v423_v37 = vpop.permute.xlu1 %422 }
 0x23f   : > { %v462_v38 = vadd.f32 %v461_v29, %v423_v37 }
 0x241   : > { %v473_v39 = vadd.f32 %v471_v36, %v462_v38 }
 0x243   : > { %474 = vst [vmem:[%s296_s28] sm:$0xf] %v473_v39 }
 0x244 PF: > { %s17_s24 = sadd.s32 1, %s609_s24  }
 0x245   : > { %p14_p4 = scmp.ge.s32.totalorder %s17_s24, 4  }
 0x247   :  { %16 = sbr.rel (!%p14_p4) target bundleno = 1 (0x1), region = 81 }

// kernel: unet2_forward.15
= control target key start
LH: loop header
LB: loop body
LE: loop exit
PB: predicated region body
PF: predicated region fallthrough
CT: control target
= control target key end

     0   :  { %s706_s18 = smov 0   ;;  %s784_s0 = inlined_call_operand.vmem [shape: f32[2,384], index: 0, kind: input, shape index: {}, may-alias: {0,1}]   ;;  %s785_s1 = inlined_call_operand.vmem [shape: f32[2,384], index: 1, kind: input, shape index: {}, may-alias: {0,1}]   ;;  %s786_s2 = inlined_call_operand.vmem [shape: bf16[128,128], index: 2, kind: input, shape index: {}]   ;;  %s787_s3 = inlined_call_operand.vmem [shape: bf16[128,128], index: 3, kind: input, shape index: {}]   ;;  %s788_s4 = inlined_call_operand.vmem [shape: f32[2,256], index: 4, kind: input, shape index: {}]   ;;  %s789_s5 = inlined_call_operand.vmem [shape: f32[2,256], index: 5, kind: output, shape index: {}]  }
   0x1 LB: > { %s712_s19 = sadd.s32 4294967295, %s672_s18   ;;  %p559_p0 = scmp.ge.s32.totalorder %s672_s18, 1  ;;  %s672_s18 = sphi %s706_s18, %s15_s18  }
   0x2   : > { %p208_p1 = scmp.lt.s32.totalorder %s672_s18, 3 }
   0x4   : > { %p209_p2 = pnand %p559_p0, %p208_p1 }
   0x5   : > { %v650_v0 = vld [vmem:[%s787_s3] sm:$0xff] (!%p209_p2)   ;;  %v674_v1 = vmov (!%p209_p2), 0.0   ;;  %v652_v3 = vld [vmem:[%s787_s3 + $0x8] sm:$0xff] (!%p209_p2)   ;;  %vm675_vm0 = vmmov (!%p209_p2), 0   ;;  %v654_v5 = vld [vmem:[%s787_s3 + $0x10] sm:$0xff] (!%p209_p2)   ;;  %s247_s7 = sadd.s32 (!%p209_p2), 1, %s712_s19 }
   0x6   : > { %212 = sbr.rel (%p209_p2) target bundleno = 258 (0x102), region = 40  ;;  %600 = vmatprep.subr.bf16.mxu0 (!%p209_p2), %v674_v1  ;;  %620 = vmatprep.subr.bf16.mxu1 (!%p209_p2), %v674_v1  ;;  %v651_v2 = vld [vmem:[%s786_s2] sm:$0xff] (!%p209_p2)   ;;  %v653_v4 = vld [vmem:[%s786_s2 + $0x8] sm:$0xff] (!%p209_p2)   ;;  %v655_v6 = vld [vmem:[%s786_s2 + $0x10] sm:$0xff] (!%p209_p2)   ;;  %p248_p3 = scmp.lt.s32.totalorder (!%p209_p2), %s247_s7, 2 }
   0x7   : > { %601 = vmatpush3.bf16.msra.mxu0 (!%p209_p2), %v650_v0  ;;  %616 = vmatprep.mubr.msk.bf16.mxu0 (!%p209_p2), %vm675_vm0, %v674_v1  ;;  %v656_v7 = vld [vmem:[%s787_s3 + $0x18] sm:$0xff] (!%p209_p2)   ;;  %p243_p4 = scmp.lt.s32.totalorder (!%p209_p2), %s712_s19, 2  ;;  %v658_v9 = vld [vmem:[%s787_s3 + $0x20] sm:$0xff] (!%p209_p2)   ;;  %v660_v11 = vld [vmem:[%s787_s3 + $0x28] sm:$0xff] (!%p209_p2)   ;;  %p253_p5 = scmp.lt.s32.totalorder (!%p209_p2), %s712_s19, 1 }
   0x8   : > { %621 = vmatpush3.bf16.msra.mxu1 (!%p209_p2), %v651_v2  ;;  %602 = vmatprep.subr.bf16.mxu0 (!%p209_p2), %v674_v1  ;;  %v657_v8 = vld [vmem:[%s786_s2 + $0x18] sm:$0xff] (!%p209_p2)   ;;  %v659_v10 = vld [vmem:[%s786_s2 + $0x20] sm:$0xff] (!%p209_p2)   ;;  %v661_v12 = vld [vmem:[%s786_s2 + $0x28] sm:$0xff] (!%p209_p2)  }
   0x9   : > { %622 = vmatprep.subr.bf16.mxu1 (!%p209_p2), %v674_v1  ;;  %636 = vmatprep.mubr.msk.bf16.mxu1 (!%p209_p2), %vm675_vm0, %v674_v1  ;;  %v662_v13 = vld [vmem:[%s787_s3 + $0x30] sm:$0xff] (!%p209_p2)   ;;  %v664_v15 = vld [vmem:[%s787_s3 + $0x38] sm:$0xff] (!%p209_p2)  }
   0xa   : > { %v663_v14 = vld [vmem:[%s786_s2 + $0x30] sm:$0xff] (!%p209_p2)   ;;  %v665_v17 = vld [vmem:[%s786_s2 + $0x38] sm:$0xff] (!%p209_p2)  }
   0xb   : > { %603 = vmatpush3.bf16.msra.mxu0 (!%p209_p2), %v652_v3 }
   0xc   : > { %623 = vmatpush3.bf16.msra.mxu1 (!%p209_p2), %v653_v4  ;;  %604 = vmatprep.subr.bf16.mxu0 (!%p209_p2), %v674_v1 }
   0xd   : > { %624 = vmatprep.subr.bf16.mxu1 %v674_v1  ;;  %s791_s7 = smov (!%p248_p3, %s247_s7), 2 }
   0xe   : > { %s244_s16 = scalar_select %p243_p4, %s712_s19, 2 }
   0xf   : > { %605 = vmatpush3.bf16.msra.mxu0 %v654_v5  ;;  %s561_s23 = sshll.u32 %s791_s7, 1  ;;  %s793_s19 = smov (!%p253_p5, %s712_s19), 1 }
  0x10   : > { %625 = vmatpush3.bf16.msra.mxu1 %v655_v6  ;;  %606 = vmatprep.subr.bf16.mxu0 %v674_v1  ;;  %s560_s24 = sshll.u32 %s244_s16, 1  ;;  %s251_s6 = scalar_lea.vmem %s785_s1, %s561_s23 }
  0x11   : > { %626 = vmatprep.subr.bf16.mxu1 %v674_v1  ;;  %s246_s7 = scalar_lea.vmem %s784_s0, %s560_s24  ;;  %v264_v16 = vld [vmem:[%s251_s6] sm:$0x3]  ;;  %s562_s14 = sshll.u32 %s793_s19, 1 }
  0x12   : > { %v262_v18 = vld [vmem:[%s246_s7] sm:$0x3]  ;;  %v265_v19 = vpack.c.bf16 %v264_v16, %v264_v16  ;;  %s256_s17 = scalar_lea.vmem %s788_s4, %s562_s14  ;;  %s260_s22 = scalar_lea.vmem %s789_s5, %s562_s14 }
  0x13   : > { %607 = vmatpush3.bf16.msra.mxu0 %v656_v7  ;;  %v263_v20 = vpack.c.bf16 %v262_v18, %v262_v18  ;;  %v474_v23 = vld [vmem:[%s256_s17] sm:$0x3] }
  0x14   : > { %627 = vmatpush3.bf16.msra.mxu1 %v657_v8  ;;  %608 = vmatprep.subr.bf16.mxu0 %v674_v1 }
  0x15   : > { %628 = vmatprep.subr.bf16.mxu1 %v674_v1 }
  0x17   : > { %609 = vmatpush3.bf16.msra.mxu0 %v658_v9 }
  0x18   : > { %629 = vmatpush3.bf16.msra.mxu1 %v659_v10  ;;  %610 = vmatprep.subr.bf16.mxu0 %v674_v1 }
  0x19   : > { %630 = vmatprep.subr.bf16.mxu1 %v674_v1 }
  0x1b   : > { %611 = vmatpush3.bf16.msra.mxu0 %v660_v11 }
  0x1c   : > { %631 = vmatpush3.bf16.msra.mxu1 %v661_v12  ;;  %612 = vmatprep.subr.bf16.mxu0 %v674_v1 }
  0x1d   : > { %632 = vmatprep.subr.bf16.mxu1 %v674_v1 }
  0x1f   : > { %613 = vmatpush3.bf16.msra.mxu0 %v662_v13 }
  0x20   : > { %633 = vmatpush3.bf16.msra.mxu1 %v663_v14  ;;  %614 = vmatprep.subr.bf16.mxu0 %v674_v1 }
  0x21   : > { %634 = vmatprep.subr.bf16.mxu1 %v674_v1 }
  0x23   : > { %615 = vmatpush3.bf16.msra.mxu0 %v664_v15 }
  0x24   : > { %635 = vmatpush3.bf16.msra.mxu1 %v665_v17 }
  0x26   : > { %617 = vmatmul.mubr.bf16.vlgmr.msra.gmra.mrb[0].mxu0 %v265_v19 }
  0x27   : > { %637 = vmatmul.mubr.bf16.vlgmr.msra.gmra.mrb[0].mxu1 %v263_v20 }
  0xf9   : > { %v380_v21 = vpop.f32.mrb[0].mxu0 }
  0xfa   : > { %v468_v22 = vpop.f32.mrb[0].mxu1  ;;  %v618_v24 = vpop.f32.mrb[1].mxu0 }
  0xfb   : > { %v469_v25 = vadd.f32 %v468_v22, %v380_v21  ;;  %v638_v26 = vpop.f32.mrb[1].mxu1  ;;  %v383_v27 = vpop.f32.mrb[2].mxu0 }
  0xfc   : > { %v471_v28 = vpop.f32.mrb[2].mxu1  ;;  %v619_v29 = vpop.f32.mrb[3].mxu0 }
  0xfd   : > { %v475_v30 = vadd.f32 %v474_v23, %v469_v25  ;;  %v639_v31 = vpop.f32.mrb[3].mxu1 }
  0xff   : > { %v476_v32 = vmul.f32 0.5, %v475_v30 }
 0x101   : > { %477 = vst [vmem:[%s260_s22] sm:$0x3] %v476_v32 }
 0x102 PF: > { %s15_s18 = sadd.s32 1, %s672_s18  }
 0x103   : > { %p12_p6 = scmp.ge.s32.totalorder %s15_s18, 4  }
 0x105   :  { %14 = sbr.rel (!%p12_p6) target bundleno = 1 (0x1), region = 76 }

</bundles_post_ra>
